<compile_context>
chip_gen: v7x
topology: tpu7x:2x2x1
jax: 0.10.0
libtpu: 0.0.40
codegen_flags: <defaults>
</compile_context>

<pallas_src>
import functools
import math

import jax
import jax.numpy as jnp
from jax.experimental import pallas as pl
from jax.experimental.pallas import tpu as pltpu

BN_EPS = 1e-5
LN_EPS = 1e-5
VMEM_LIMIT = 48 * 1024 * 1024  # safe on v5e/v6e (128 MiB) and v7x (64 MiB)


def _round_up(x, m):
    return (x + m - 1) // m * m


# --------------------------------------------------------------------------
# Generic tiled matmul kernel (bf16 in, f32 accumulate, fused scale/bias/act)
# --------------------------------------------------------------------------
def _matmul_kernel(a_ref, b_ref, s_ref, c_ref, o_ref, acc_ref, *, activation):
    @pl.when(pl.program_id(2) == 0)
    def _init():
        acc_ref[...] = jnp.zeros_like(acc_ref)

    acc_ref[...] += jnp.dot(a_ref[...], b_ref[...],
                            preferred_element_type=jnp.float32)

    @pl.when(pl.program_id(2) == pl.num_programs(2) - 1)
    def _finish():
        r = acc_ref[...] * s_ref[...] + c_ref[...]
        if activation == "relu":
            r = jnp.maximum(r, 0.0)
        elif activation == "gelu":
            r = jax.nn.gelu(r)   # TODO(synk): tanh approx (PyTorch default is erf)
        o_ref[...] = r.astype(o_ref.dtype)


@functools.lru_cache(maxsize=None)
def _build_matmul(Mp, Kp, Np, tm, tk, tn, activation, out_dtype_name):
    f = pl.pallas_call(
        functools.partial(_matmul_kernel, activation=activation),
        out_shape=jax.ShapeDtypeStruct((Mp, Np), jnp.dtype(out_dtype_name)),
        grid_spec=pltpu.PrefetchScalarGridSpec(
            num_scalar_prefetch=0,
            grid=(Mp // tm, Np // tn, Kp // tk),
            in_specs=[
                pl.BlockSpec((tm, tk), lambda i, j, k: (i, k)),
                pl.BlockSpec((tk, tn), lambda i, j, k: (k, j)),
                pl.BlockSpec((1, tn), lambda i, j, k: (0, j)),
                pl.BlockSpec((1, tn), lambda i, j, k: (0, j)),
            ],
            out_specs=pl.BlockSpec((tm, tn), lambda i, j, k: (i, j)),
            scratch_shapes=[pltpu.VMEM((tm, tn), jnp.float32)],
        ),
        compiler_params=pltpu.CompilerParams(
            dimension_semantics=("parallel", "parallel", "arbitrary"),
            vmem_limit_bytes=VMEM_LIMIT),
    )
    return jax.jit(f)


def pallas_matmul(a, b, scale=None, bias=None, activation="none",
                  out_dtype=jnp.bfloat16):
    """out = act((a @ b) * scale + bias); scale/bias broadcast per output col."""
    M, K = a.shape
    _, N = b.shape
    # Adaptive tiles: full-dim single step when small, 512 otherwise.
    tm = 512 if M >= 512 else max(M, 1)
    tk = 512 if K > 640 else max(K, 1)
    tn = 512 if N >= 512 else max(N, 1)
    Mp, Kp, Np = _round_up(M, tm), _round_up(K, tk), _round_up(N, tn)

    a = a.astype(jnp.bfloat16)
    b = b.astype(jnp.bfloat16)
    if (Mp, Kp) != (M, K):
        a = jnp.pad(a, ((0, Mp - M), (0, Kp - K)))
    if (Kp, Np) != (K, N):
        b = jnp.pad(b, ((0, Kp - K), (0, Np - N)))

    if scale is None:
        scale = jnp.ones((N,), jnp.float32)
    if bias is None:
        bias = jnp.zeros((N,), jnp.float32)
    s = scale.astype(jnp.float32)
    c = bias.astype(jnp.float32)
    if Np != N:
        s = jnp.pad(s, (0, Np - N))
        c = jnp.pad(c, (0, Np - N))

    out = _build_matmul(Mp, Kp, Np, tm, tk, tn, activation,
                        jnp.dtype(out_dtype).name)(
        a, b, s.reshape(1, Np), c.reshape(1, Np))
    if (Mp, Np) != (M, N):
        out = out[:M, :N]
    return out


# --------------------------------------------------------------------------
# Fused 3x3 / stride-1 convolution kernel (no im2col in HBM)
# --------------------------------------------------------------------------
def _conv3x3_kernel(x_ref, w_ref, s_ref, b_ref, o_ref, *, th, w_out, relu):
    # x_ref: (H+2, W+2, Cin) f32, whole padded feature map resident in VMEM
    # w_ref: (9, Cin, Cout) bf16     s_ref/b_ref: (1, Cout) f32
    # o_ref: (th, W, Cout) bf16  (row tile of the output)
    i = pl.program_id(0)
    scale = s_ref[...]
    bias = b_ref[...]
    cout = o_ref.shape[-1]

    def row_body(r, carry):
        base = i * th + r
        acc = jnp.zeros((w_out, cout), jnp.float32)
        for dy in range(3):
            row = x_ref[base + dy]                       # (W+2, Cin) f32
            for dx in range(3):
                a = row[dx:dx + w_out, :].astype(jnp.bfloat16)
                acc = acc + jnp.dot(a, w_ref[3 * dy + dx],
                                    preferred_element_type=jnp.float32)
        res = acc * scale + bias
        if relu:
            res = jnp.maximum(res, 0.0)
        o_ref[r] = res.astype(o_ref.dtype)
        return carry

    jax.lax.fori_loop(0, th, row_body, 0)


@functools.lru_cache(maxsize=None)
def _build_conv3x3(H, W, Cin, Cout, relu):
    th = 8 if H % 8 == 0 else H
    f = pl.pallas_call(
        functools.partial(_conv3x3_kernel, th=th, w_out=W, relu=relu),
        out_shape=jax.ShapeDtypeStruct((H, W, Cout), jnp.bfloat16),
        grid_spec=pltpu.PrefetchScalarGridSpec(
            num_scalar_prefetch=0,
            grid=(H // th,),
            in_specs=[
                pl.BlockSpec((H + 2, W + 2, Cin), lambda i: (0, 0, 0)),
                pl.BlockSpec((9, Cin, Cout), lambda i: (0, 0, 0)),
                pl.BlockSpec((1, Cout), lambda i: (0, 0)),
                pl.BlockSpec((1, Cout), lambda i: (0, 0)),
            ],
            out_specs=pl.BlockSpec((th, W, Cout), lambda i: (i, 0, 0)),
        ),
        compiler_params=pltpu.CompilerParams(
            dimension_semantics=("parallel",),
            vmem_limit_bytes=VMEM_LIMIT),
    )
    return jax.jit(f)


def conv3x3_same(x, w, scale=None, bias=None, relu=False):
    """x: (N,H,W,Cin) NHWC; w: (3,3,Cin,Cout); stride 1, SAME zero padding."""
    N, H, W, Cin = x.shape
    Cout = w.shape[-1]
    if scale is None:
        scale = jnp.ones((Cout,), jnp.float32)
    if bias is None:
        bias = jnp.zeros((Cout,), jnp.float32)
    wq = w.reshape(9, Cin, Cout).astype(jnp.bfloat16)
    s2 = scale.astype(jnp.float32).reshape(1, Cout)
    b2 = bias.astype(jnp.float32).reshape(1, Cout)
    call = _build_conv3x3(H, W, Cin, Cout, bool(relu))
    outs = []
    for n in range(N):
        xp = jnp.pad(x[n].astype(jnp.float32), ((1, 1), (1, 1), (0, 0)))
        outs.append(call(xp, wq, s2, b2))
    return jnp.stack(outs, axis=0)


# --------------------------------------------------------------------------
# LayerNorm kernel
# --------------------------------------------------------------------------
def _ln_kernel(x_ref, g_ref, b_ref, o_ref, *, eps):
    x = x_ref[...].astype(jnp.float32)
    mu = jnp.mean(x, axis=-1, keepdims=True)
    xc = x - mu
    var = jnp.mean(xc * xc, axis=-1, keepdims=True)
    o_ref[...] = (xc * jax.lax.rsqrt(var + eps) * g_ref[...]
                  + b_ref[...]).astype(o_ref.dtype)


@functools.lru_cache(maxsize=None)
def _build_ln(R, D, eps):
    f = pl.pallas_call(
        functools.partial(_ln_kernel, eps=eps),
        out_shape=jax.ShapeDtypeStruct((R, D), jnp.float32),
        grid=(1,),
        in_specs=[
            pl.BlockSpec((R, D), lambda i: (0, 0)),
            pl.BlockSpec((1, D), lambda i: (0, 0)),
            pl.BlockSpec((1, D), lambda i: (0, 0)),
        ],
        out_specs=pl.BlockSpec((R, D), lambda i: (0, 0)),
    )
    return jax.jit(f)


def layer_norm(x2d, g, b, eps=LN_EPS):
    R, D = x2d.shape
    return _build_ln(R, D, float(eps))(x2d, g.reshape(1, D), b.reshape(1, D))


# --------------------------------------------------------------------------
# Multi-head attention (all heads in one grid step)
# --------------------------------------------------------------------------
def _attn_kernel(q_ref, k_ref, v_ref, o_ref, *, scale):
    q = q_ref[...].astype(jnp.float32)
    k = k_ref[...].astype(jnp.float32)
    v = v_ref[...].astype(jnp.float32)
    s = jnp.einsum('bqd,bkd->bqk', q, k,
                   preferred_element_type=jnp.float32) * scale
    s = s - jnp.max(s, axis=-1, keepdims=True)
    p = jnp.exp(s)
    p = p * pl.reciprocal(jnp.sum(p, axis=-1, keepdims=True), approx=True)
    o_ref[...] = jnp.einsum('bqk,bkd->bqd', p, v,
                            preferred_element_type=jnp.float32
                            ).astype(o_ref.dtype)


@functools.lru_cache(maxsize=None)
def _build_attn(BH, S, hd):
    f = pl.pallas_call(
        functools.partial(_attn_kernel, scale=1.0 / math.sqrt(hd)),
        out_shape=jax.ShapeDtypeStruct((BH, S, hd), jnp.float32),
        grid=(1,),
        in_specs=[pl.BlockSpec((BH, S, hd), lambda i: (0, 0, 0))] * 3,
        out_specs=pl.BlockSpec((BH, S, hd), lambda i: (0, 0, 0)),
    )
    return jax.jit(f)


def multi_head_attention(q, k, v):
    BH, S, hd = q.shape
    return _build_attn(BH, S, hd)(q, k, v)


# --------------------------------------------------------------------------
# Conv dispatcher / pooling / resize
# --------------------------------------------------------------------------
def conv2d(x, w, scale=None, bias=None, activation="none", stride=1):
    """x: (N,H,W,Cin) NHWC, w: (KH,KW,Cin,Cout), SAME padding for odd kernels."""
    N, H, W, Cin = x.shape
    KH, KW, _, Cout = w.shape
    if KH == 3 and KW == 3 and stride == 1:
        return conv3x3_same(x, w, scale=scale, bias=bias,
                            relu=(activation == "relu"))
    if KH == 1 and KW == 1 and stride == 1:
        out = pallas_matmul(x.reshape(N * H * W, Cin), w.reshape(Cin, Cout),
                            scale=scale, bias=bias, activation=activation)
        return out.reshape(N, H, W, Cout)
    # stride-2 stem (Cin=1): im2col is tiny here.
    ph, pw = KH // 2, KW // 2
    Ho = (H + 2 * ph - KH) // stride + 1
    Wo = (W + 2 * pw - KW) // stride + 1
    xp = jnp.pad(x, ((0, 0), (ph, ph), (pw, pw), (0, 0)))
    cols = []
    for dy in range(KH):
        for dx in range(KW):
            cols.append(xp[:, dy:dy + stride * Ho:stride,
                           dx:dx + stride * Wo:stride, :])
    patches = jnp.concatenate(cols, axis=-1).reshape(N * Ho * Wo, KH * KW * Cin)
    out = pallas_matmul(patches, w.reshape(KH * KW * Cin, Cout),
                        scale=scale, bias=bias, activation=activation)
    return out.reshape(N, Ho, Wo, Cout)


def avgpool2(x):  # AvgPool2d(kernel=2, stride=2)
    N, H, W, C = x.shape
    return x.reshape(N, H // 2, 2, W // 2, 2, C).mean(axis=(2, 4))


def _interp_matrix(in_size, out_size):
    # bilinear, align_corners=False (half-pixel convention)
    scale = in_size / out_size
    src = jnp.maximum((jnp.arange(out_size, dtype=jnp.float32) + 0.5) * scale
                      - 0.5, 0.0)
    i0 = jnp.minimum(jnp.floor(src).astype(jnp.int32), in_size - 1)
    i1 = jnp.minimum(i0 + 1, in_size - 1)
    w1 = src - i0.astype(jnp.float32)
    w0 = 1.0 - w1
    A = jnp.zeros((out_size, in_size), jnp.float32)
    rows = jnp.arange(out_size)
    A = A.at[rows, i0].add(w0)
    A = A.at[rows, i1].add(w1)
    return A


def bilinear_resize(x, out_h, out_w, out_dtype=jnp.bfloat16):
    """Separable bilinear resize expressed as two Pallas matmuls."""
    N, H, W, C = x.shape
    Ah = _interp_matrix(H, out_h)
    Aw = _interp_matrix(W, out_w)
    t = jnp.transpose(x, (1, 0, 2, 3)).reshape(H, N * W * C)
    t = pallas_matmul(Ah, t).reshape(out_h, N, W, C)
    u = jnp.transpose(t, (2, 1, 0, 3)).reshape(W, N * out_h * C)
    u = pallas_matmul(Aw, u, out_dtype=out_dtype).reshape(out_w, N, out_h, C)
    return jnp.transpose(u, (1, 2, 0, 3))


# --------------------------------------------------------------------------
# Parameter construction (mirrors the PyTorch module layout)
# --------------------------------------------------------------------------
class ParamGen:
    def __init__(self, seed=0):
        self.key = jax.random.PRNGKey(seed)

    def _next(self):
        self.key, sub = jax.random.split(self.key)
        return sub

    def conv_w(self, kh, kw, cin, cout):
        std = math.sqrt(2.0 / (kh * kw * cin))
        return jax.random.normal(self._next(), (kh, kw, cin, cout),
                                 jnp.float32) * std

    def linear_w(self, fin, fout):
        std = math.sqrt(1.0 / fin)
        return jax.random.normal(self._next(), (fin, fout), jnp.float32) * std


def init_convlayer(pg, cin, cout, kernel=3, stride=1):
    # ConvLayer = Conv(bias=False) + BatchNorm(eval, default buffers) + ReLU
    bn_scale = 1.0 / math.sqrt(1.0 + BN_EPS)
    return {
        "w": pg.conv_w(kernel, kernel, cin, cout),
        "stride": stride,
        "scale": jnp.full((cout,), bn_scale, jnp.float32),
        "bias": jnp.zeros((cout,), jnp.float32),
    }


def convlayer_forward(p, x):
    return conv2d(x, p["w"], scale=p["scale"], bias=p["bias"],
                  activation="relu", stride=p["stride"])


def get_link(layer, base_ch, growth_rate, grmul):
    if layer == 0:
        return base_ch, 0, []
    out_channels = growth_rate
    link = []
    for i in range(10):
        dv = 2 ** i
        if layer % dv == 0:
            k = layer - dv
            link.append(k)
            if i > 0:
                out_channels *= grmul
    out_channels = int(int(out_channels + 1) / 2) * 2
    in_channels = 0
    for i in link:
        ch, _, _ = get_link(i, base_ch, growth_rate, grmul)
        in_channels += ch
    return out_channels, in_channels, link


def init_hard_block(pg, in_channels, growth_rate, grmul, n_layers):
    links, layers = [], []
    out_channels = 0
    for i in range(n_layers):
        outch, inch, link = get_link(i + 1, in_channels, growth_rate, grmul)
        links.append(link)
        layers.append(init_convlayer(pg, inch, outch, kernel=3))
        if i % 2 == 0 or i == n_layers - 1:
            out_channels += outch
    return {"links": links, "layers": layers, "out_channels": out_channels}


def hard_block_forward(params, x, keep_base=False):
    layers_ = [x]
    for li, link in enumerate(params["links"]):
        tin = [layers_[i] for i in link]
        xi = jnp.concatenate(tin, axis=-1) if len(tin) > 1 else tin[0]
        layers_.append(convlayer_forward(params["layers"][li], xi))
    t = len(layers_)
    out_ = []
    for i in range(t):
        if (i == 0 and keep_base) or i == t - 1 or i % 2 == 1:
            out_.append(layers_[i])
    return jnp.concatenate(out_, axis=-1)


def make_pe(max_len, d_model):
    position = jnp.arange(max_len, dtype=jnp.float32)[:, None]
    div_term = jnp.exp(jnp.arange(0, d_model, 2, dtype=jnp.float32)
                       * (-math.log(10000.0) / d_model))
    pe = jnp.zeros((max_len, d_model), jnp.float32)
    pe = pe.at[:, 0::2].set(jnp.sin(position * div_term))
    pe = pe.at[:, 1::2].set(jnp.cos(position * div_term))
    return pe[:, None, :]  # (max_len, 1, d_model)


def init_transformer(pg, dim, depth, mlp_dim):
    layers = []
    for _ in range(depth):
        wq = pg.linear_w(dim, dim)
        wk = pg.linear_w(dim, dim)
        wv = pg.linear_w(dim, dim)
        layers.append({
            "ln1_g": jnp.ones((dim,), jnp.float32),
            "ln1_b": jnp.zeros((dim,), jnp.float32),
            "wqkv": jnp.concatenate([wq, wk, wv], axis=1),   # fused Q|K|V
            "bqkv": jnp.zeros((3 * dim,), jnp.float32),
            "wo": pg.linear_w(dim, dim), "bo": jnp.zeros((dim,), jnp.float32),
            "ln2_g": jnp.ones((dim,), jnp.float32),
            "ln2_b": jnp.zeros((dim,), jnp.float32),
            "w1": pg.linear_w(dim, mlp_dim),
            "b1": jnp.zeros((mlp_dim,), jnp.float32),
            "w2": pg.linear_w(mlp_dim, dim),
            "b2": jnp.zeros((dim,), jnp.float32),
        })
    return layers


def transformer_forward(layers, x, heads):
    # TODO(synk): TransformerModel is not defined in the reference file; this
    # is a standard pre-LN encoder (MHA + GELU MLP) with the declared params.
    B, S, D = x.shape
    hd = D // heads
    for p in layers:
        h = layer_norm(x.reshape(B * S, D), p["ln1_g"], p["ln1_b"])
        qkv = pallas_matmul(h, p["wqkv"], bias=p["bqkv"],
                            out_dtype=jnp.float32)
        q, k, v = qkv[:, :D], qkv[:, D:2 * D], qkv[:, 2 * D:]

        def split(t):
            return jnp.transpose(t.reshape(B, S, heads, hd),
                                 (0, 2, 1, 3)).reshape(B * heads, S, hd)

        o = multi_head_attention(split(q), split(k), split(v))
        o = jnp.transpose(o.reshape(B, heads, S, hd),
                          (0, 2, 1, 3)).reshape(B * S, D)
        o = pallas_matmul(o, p["wo"], bias=p["bo"], out_dtype=jnp.float32)
        x = x + o.reshape(B, S, D)

        h = layer_norm(x.reshape(B * S, D), p["ln2_g"], p["ln2_b"])
        h = pallas_matmul(h, p["w1"], bias=p["b1"], activation="gelu")
        h = pallas_matmul(h, p["w2"], bias=p["b2"], out_dtype=jnp.float32)
        x = x + h.reshape(B, S, D)
    return x


def init_model(seed=0, n_channels=1, n_classes=6):
    pg = ParamGen(seed)
    P = {}
    first_ch = [16, 24, 32, 48]
    ch_list = [64, 96, 160, 224, 320]
    grmul = 1.7
    gr = [10, 16, 18, 24, 32]
    n_layers = [4, 4, 8, 8, 8]
    blks = len(n_layers)

    base, shortcut_layers, skip_counts = [], [], []
    base.append(("conv", init_convlayer(pg, n_channels, first_ch[0], 3, 2)))
    base.append(("conv", init_convlayer(pg, first_ch[0], first_ch[1], 3)))
    base.append(("conv", init_convlayer(pg, first_ch[1], first_ch[2], 3)))
    base.append(("conv", init_convlayer(pg, first_ch[2], first_ch[3], 3)))
    ch = first_ch[3]
    for i in range(blks):
        blk = init_hard_block(pg, ch, gr[i], grmul, n_layers[i])
        ch = blk["out_channels"]
        skip_counts.append(ch)
        base.append(("hard", blk))
        if i < blks - 1:
            shortcut_layers.append(len(base) - 1)
        base.append(("conv", init_convlayer(pg, ch, ch_list[i], 1)))
        ch = ch_list[i]
        if i < blks - 1:
            base.append(("pool", None))
    P["base"] = base
    P["shortcut_layers"] = shortcut_layers

    emb = 512
    P["emb"] = emb
    P["heads"] = 8
    P["conv_x_w"] = pg.conv_w(3, 3, 320, emb)
    P["conv_x_b"] = jnp.zeros((emb,), jnp.float32)
    P["pe"] = make_pe(64, emb)
    P["transformer"] = init_transformer(pg, emb, 4, 4096)
    P["pre_head_g"] = jnp.ones((emb,), jnp.float32)
    P["pre_head_b"] = jnp.zeros((emb,), jnp.float32)

    bn_s = 1.0 / math.sqrt(1.0 + BN_EPS)
    P["conv1_w"] = pg.conv_w(1, 1, emb, emb)
    conv1_b = jnp.zeros((emb,), jnp.float32)
    P["bn1_scale"] = jnp.full((emb,), bn_s, jnp.float32)
    P["bn1_bias"] = conv1_b * bn_s
    P["conv2_w"] = pg.conv_w(1, 1, emb, 320)
    P["conv2_b"] = jnp.zeros((320,), jnp.float32)

    # decoder
    prev = ch  # 320
    conv1x1_up, dense_up = [], []
    n_blocks = blks - 1
    cur = prev
    for i in range(n_blocks - 1, -1, -1):
        cur = prev + skip_counts[i]
        conv1x1_up.append(init_convlayer(pg, cur, cur // 2, 1))
        cur = cur // 2
        blk = init_hard_block(pg, cur, gr[i], grmul, n_layers[i])
        dense_up.append(blk)
        prev = blk["out_channels"]
        cur = prev
    P["conv1x1_up"] = conv1x1_up
    P["dense_up"] = dense_up
    P["n_blocks"] = n_blocks
    P["final_w"] = pg.conv_w(1, 1, cur, n_classes)
    P["final_b"] = jnp.zeros((n_classes,), jnp.float32)
    return P


# --------------------------------------------------------------------------
# Full forward pass (input NCHW -> NHWC internally -> NCHW output)
# --------------------------------------------------------------------------
def forward(P, x_nchw):
    x = jnp.transpose(x_nchw, (0, 2, 3, 1)).astype(jnp.float32)
    N = x.shape[0]
    emb = P["emb"]

    skips = []
    for idx, (kind, p) in enumerate(P["base"]):
        if kind == "conv":
            x = convlayer_forward(p, x)
        elif kind == "hard":
            x = hard_block_forward(p, x)
        else:
            x = avgpool2(x)
        if idx in P["shortcut_layers"]:
            skips.append(x)

    # ---- encode ----
    x = conv2d(x, P["conv_x_w"], bias=P["conv_x_b"])           # (N, 8, 8, 512)
    seq = x.reshape(N, -1, emb).astype(jnp.float32)            # (N, 64, 512)
    seq = seq + P["pe"][:N]     # reproduces `x + pe[:x.size(0)]` broadcasting
    seq = transformer_forward(P["transformer"], seq, P["heads"])
    S = seq.shape[1]
    seq = layer_norm(seq.reshape(N * S, emb),
                     P["pre_head_g"], P["pre_head_b"]).reshape(N, S, emb)

    # ---- decode ----
    out = seq.reshape(N, 8, 8, emb)
    out = conv2d(out, P["conv1_w"], scale=P["bn1_scale"], bias=P["bn1_bias"],
                 activation="relu")
    out = conv2d(out, P["conv2_w"], bias=P["conv2_b"])         # (N, 8, 8, 320)

    # ---- decoder with skip connections ----
    for i in range(P["n_blocks"]):
        skip = skips.pop()
        out = bilinear_resize(out, skip.shape[1], skip.shape[2])
        out = jnp.concatenate([out, skip.astype(out.dtype)], axis=-1)
        out = convlayer_forward(P["conv1x1_up"][i], out)
        out = hard_block_forward(P["dense_up"][i], out)

    out = conv2d(out, P["final_w"], bias=P["final_b"])
    out = bilinear_resize(out, 224, 224, out_dtype=jnp.float32)
    return jnp.transpose(out, (0, 3, 1, 2))  # NCHW


if __name__ == "__main__":
    # The module's decode path hard-codes an 8x8 bottleneck (view(N,8,8,512)),
    # which implies a 256x256 input (stride-2 stem + 4 AvgPool2d => /32).
    key = jax.random.PRNGKey(0)
    x = jax.random.normal(key, (1, 1, 256, 256), jnp.float32)  # NCHW

    params = init_model(seed=0, n_channels=1, n_classes=6)
    out = forward(params, x)
    out = jax.block_until_ready(out)

    assert out.shape == (1, 6, 224, 224), out.shape
    assert bool(jnp.all(jnp.isfinite(out)))
    print("KERNEL_OK")
</pallas_src>

<mosaic_0001>
module attributes {stable_mosaic.version = 11 : i64} {
  func.func @_matmul_kernel(%arg0: i32, %arg1: i32, %arg2: i32, %arg3: memref<512x9xbf16, #tpu.memory_space<vmem>>, %arg4: memref<9x16xbf16, #tpu.memory_space<vmem>>, %arg5: memref<1x16xf32, #tpu.memory_space<vmem>>, %arg6: memref<1x16xf32, #tpu.memory_space<vmem>>, %arg7: memref<512x16xbf16, #tpu.memory_space<vmem>>, %arg8: memref<512x16xf32, #tpu.memory_space<vmem>>) attributes {dimension_semantics = [#tpu.dimension_semantics<parallel>, #tpu.dimension_semantics<parallel>, #tpu.dimension_semantics<arbitrary>], iteration_bounds = array<i64: 32, 1, 1>, scalar_prefetch = 0 : i64, scratch_operands = 1 : i64, tpu.core_type = #tpu.core_type<tc>, window_params = [{transform_indices = @transform_0, window_bounds = array<i64: 512, 9>}, {transform_indices = @transform_1, window_bounds = array<i64: 9, 16>}, {transform_indices = @transform_2, window_bounds = array<i64: 1, 16>}, {transform_indices = @transform_3, window_bounds = array<i64: 1, 16>}, {transform_indices = @transform_4, window_bounds = array<i64: 512, 16>}]} {
    %c0_i32 = arith.constant 0 : i32
    %0 = arith.cmpi eq, %arg2, %c0_i32 : i32
    %1 = arith.extui %0 : i1 to i32
    %c0_i32_0 = arith.constant 0 : i32
    %2 = arith.cmpi ne, %1, %c0_i32_0 : i32
    scf.if %2 {
      %cst_10 = arith.constant 0.000000e+00 : f32
      %12 = vector.broadcast %cst_10 : f32 to vector<512x16xf32>
      %c0_11 = arith.constant 0 : index
      %c0_12 = arith.constant 0 : index
      %13 = vector.load %arg8[%c0_11, %c0_12] : memref<512x16xf32, #tpu.memory_space<vmem>>, vector<512x16xf32>
      tpu.vector_store %arg8[%c0_11, %c0_12], %12 {strides = array<i32>} : memref<512x16xf32, #tpu.memory_space<vmem>>, vector<512x16xf32>,
    } else {
    }
    %c0 = arith.constant 0 : index
    %c0_1 = arith.constant 0 : index
    %3 = vector.load %arg8[%c0, %c0_1] : memref<512x16xf32, #tpu.memory_space<vmem>>, vector<512x16xf32>
    %c0_2 = arith.constant 0 : index
    %c0_3 = arith.constant 0 : index
    %4 = vector.load %arg3[%c0_2, %c0_3] : memref<512x9xbf16, #tpu.memory_space<vmem>>, vector<512x9xbf16>
    %c0_4 = arith.constant 0 : index
    %c0_5 = arith.constant 0 : index
    %5 = vector.load %arg4[%c0_4, %c0_5] : memref<9x16xbf16, #tpu.memory_space<vmem>>, vector<9x16xbf16>
    %cst = arith.constant dense<0.000000e+00> : vector<512x16xf32>
    %6 = tpu.matmul %4, %5, %cst {dimension_numbers = #tpu.dot_dimension_numbers<[1], [0], [0], [1], [0, 0, 1, 1], [], []>} : vector<512x9xbf16>, vector<9x16xbf16>, vector<512x16xf32> -> vector<512x16xf32>
    %7 = arith.addf %3, %6 : vector<512x16xf32>
    %c0_6 = arith.constant 0 : index
    %c0_7 = arith.constant 0 : index
    %8 = vector.load %arg8[%c0_6, %c0_7] : memref<512x16xf32, #tpu.memory_space<vmem>>, vector<512x16xf32>
    tpu.vector_store %arg8[%c0_6, %c0_7], %7 {strides = array<i32>} : memref<512x16xf32, #tpu.memory_space<vmem>>, vector<512x16xf32>,
    %c0_i32_8 = arith.constant 0 : i32
    %9 = arith.cmpi eq, %arg2, %c0_i32_8 : i32
    %10 = arith.extui %9 : i1 to i32
    %c0_i32_9 = arith.constant 0 : i32
    %11 = arith.cmpi ne, %10, %c0_i32_9 : i32
    scf.if %11 {
      %c0_10 = arith.constant 0 : index
      %c0_11 = arith.constant 0 : index
      %12 = vector.load %arg8[%c0_10, %c0_11] : memref<512x16xf32, #tpu.memory_space<vmem>>, vector<512x16xf32>
      %c0_12 = arith.constant 0 : index
      %c0_13 = arith.constant 0 : index
      %13 = vector.load %arg5[%c0_12, %c0_13] : memref<1x16xf32, #tpu.memory_space<vmem>>, vector<1x16xf32>
      %14 = vector.broadcast %13 : vector<1x16xf32> to vector<512x16xf32>
      %15 = arith.mulf %12, %14 : vector<512x16xf32>
      %c0_14 = arith.constant 0 : index
      %c0_15 = arith.constant 0 : index
      %16 = vector.load %arg6[%c0_14, %c0_15] : memref<1x16xf32, #tpu.memory_space<vmem>>, vector<1x16xf32>
      %17 = vector.broadcast %16 : vector<1x16xf32> to vector<512x16xf32>
      %18 = arith.addf %15, %17 : vector<512x16xf32>
      %cst_16 = arith.constant 0.000000e+00 : f32
      %19 = vector.broadcast %cst_16 : f32 to vector<512x16xf32>
      %20 = arith.maximumf %18, %19 : vector<512x16xf32>
      %21 = arith.truncf %20 : vector<512x16xf32> to vector<512x16xbf16>
      %c0_17 = arith.constant 0 : index
      %c0_18 = arith.constant 0 : index
      %22 = vector.load %arg7[%c0_17, %c0_18] : memref<512x16xbf16, #tpu.memory_space<vmem>>, vector<512x16xbf16>
      tpu.vector_store %arg7[%c0_17, %c0_18], %21 {strides = array<i32>} : memref<512x16xbf16, #tpu.memory_space<vmem>>, vector<512x16xbf16>,
    } else {
    }
    return
  }
  func.func @transform_0(%arg0: i32, %arg1: i32, %arg2: i32) -> (i32, i32) {
    %c0_i32 = arith.constant 0 : i32
    return %arg0, %arg2 : i32, i32
  }
  func.func @transform_1(%arg0: i32, %arg1: i32, %arg2: i32) -> (i32, i32) {
    %c0_i32 = arith.constant 0 : i32
    return %arg2, %arg1 : i32, i32
  }
  func.func @transform_2(%arg0: i32, %arg1: i32, %arg2: i32) -> (i32, i32) {
    %c0_i32 = arith.constant 0 : i32
    %c0_i32_0 = arith.constant 0 : i32
    return %c0_i32, %arg1 : i32, i32
  }
  func.func @transform_3(%arg0: i32, %arg1: i32, %arg2: i32) -> (i32, i32) {
    %c0_i32 = arith.constant 0 : i32
    %c0_i32_0 = arith.constant 0 : i32
    return %c0_i32, %arg1 : i32, i32
  }
  func.func @transform_4(%arg0: i32, %arg1: i32, %arg2: i32) -> (i32, i32) {
    %c0_i32 = arith.constant 0 : i32
    return %arg0, %arg1 : i32, i32
  }
}

</mosaic_0001>

<bundles_post_ra>
// kernel: tpu_custom_call.1
= control target key start
LH: loop header
LB: loop body
LE: loop exit
PB: predicated region body
PF: predicated region fallthrough
CT: control target
= control target key end

     0   :  { %s2326_s15 = smov 0   ;;  %s2328_s16 = smov 0   ;;  %s3020_s0 = inlined_call_operand.vmem [shape: bf16[16384,9], index: 0, kind: input, shape index: {}]   ;;  %s3021_s1 = inlined_call_operand.vmem [shape: bf16[9,16], index: 1, kind: input, shape index: {}]   ;;  %s3022_s2 = inlined_call_operand.vmem [shape: f32[1,16], index: 2, kind: input, shape index: {}]   ;;  %s3023_s3 = inlined_call_operand.vmem [shape: f32[1,16], index: 3, kind: input, shape index: {}]   ;;  %s3024_s4 = inlined_call_operand.vmem [shape: bf16[16384,16], index: 4, kind: output, shape index: {}]  }
   0x1   :  { %s2330_s17 = smov 0  }
   0x2 LB: > { %s33_s18 = sadd.s32 1, %s2293_s16  ;;  %p1911_p0 = scmp.ge.s32.totalorder %s2297_s17, 1  ;;  %s2297_s17 = sphi %s2330_s17, %s14_s17   ;;  %s2293_s16 = sphi %s2328_s16, %s3027_s16   ;;  %s2289_s15 = sphi %s2326_s15, %s3026_s15  }
   0x3   : > { %p35_p1 = scmp.ge.s32.totalorder %s33_s18, 32  ;;  %p221_p2 = scmp.lt.s32.totalorder %s2297_s17, 33 }
   0x5   : > { %s3029_s18 = smov (%p35_p1, %s33_s18), 0  ;;  %p222_p3 = pnand %p1911_p0, %p221_p2 }
   0x6   : > { %v2349_v0 = vld [vmem:[%s3021_s1] sm:$0x1f] (!%p222_p3)   ;;  %vm762_vm0 = vcmask (!%p222_p3), 1043456   ;;  %vm763_vm1 = vcmask (!%p222_p3), 1044480   ;;  %s1912_s21 = sshll.u32 (!%p222_p3), %s2289_s15, 6  ;;  %v2299_v1 = vmov (!%p222_p3), 65535  }
   0x7   : > { %225 = sbr.rel (%p222_p3) target bundleno = 338 (0x152), region = 36  ;;  %v764_v2 = vsel (!%p222_p3), %vm762_vm0, 4294967295, %v2299_v1  ;;  %p2354_p4 = scmp.lt.s32.totalorder (!%p222_p3), %s1912_s21, 2047  ;;  %vm305_vm2 = vcmask (!%p222_p3), 130048   ;;  %v2300_v4 = vmov (!%p222_p3), 0.0   ;;  %vm665_vm3 = vcmask (!%p222_p3), 72704  }
   0x8   : > { %v2358_v3 = vsel (!%p222_p3), %vm763_vm1, %v764_v2, 0  ;;  %308 = vst.msk [vmem:[#allocation2 + $0x10] sm:$0xff] (!%p222_p3), %vm305_vm2, %v2300_v4  ;;  %306 = vst.msk [vmem:[#allocation2] sm:$0xff] (!%p222_p3), %vm305_vm2, %v2300_v4  ;;  %v2579_v1 = vld [vmem:[%s3022_s2] ss:$0 sm:$0xff] (!%p222_p3)  ;;  %vm1716_vm4 = vcmask (!%p222_p3), 125952  }
   0x9   : > { %307 = vst.msk [vmem:[#allocation2 + $0x8] sm:$0xff] (!%p222_p3), %vm305_vm2, %v2300_v4  ;;  %309 = vst.msk [vmem:[#allocation2 + $0x18] sm:$0xff] (!%p222_p3), %vm305_vm2, %v2300_v4  ;;  %v767_v5 = vand.u32 (!%p222_p3), %v2349_v0, %v2358_v3 }
   0xa   : > { %310 = vst.msk [vmem:[#allocation2 + $0x20] sm:$0xff] (!%p222_p3), %vm305_vm2, %v2300_v4  ;;  %311 = vst.msk [vmem:[#allocation2 + $0x28] sm:$0xff] (!%p222_p3), %vm305_vm2, %v2300_v4 }
   0xb   : > { %312 = vst.msk [vmem:[#allocation2 + $0x30] sm:$0xff] (!%p222_p3), %vm305_vm2, %v2300_v4  ;;  %313 = vst.msk [vmem:[#allocation2 + $0x38] sm:$0xff] (!%p222_p3), %vm305_vm2, %v2300_v4  ;;  %2146 = vmatprep.subr.bf16.mxu0 (!%p222_p3), %v767_v5  ;;  %2212 = vmatprep.subr.bf16.mxu1 (!%p222_p3), %v767_v5 }
   0xc   : > { %314 = vst.msk [vmem:[#allocation2 + $0x40] sm:$0xff] (!%p222_p3), %vm305_vm2, %v2300_v4  ;;  %315 = vst.msk [vmem:[#allocation2 + $0x48] sm:$0xff] (!%p222_p3), %vm305_vm2, %v2300_v4  ;;  %2147 = vmatpush3.bf16.msra.mxu0 (!%p222_p3), %v767_v5  ;;  %2213 = vmatpush3.bf16.msra.mxu1 (!%p222_p3), %v767_v5 }
   0xd   : > { %316 = vst.msk [vmem:[#allocation2 + $0x50] sm:$0xff] (!%p222_p3), %vm305_vm2, %v2300_v4  ;;  %317 = vst.msk [vmem:[#allocation2 + $0x58] sm:$0xff] (!%p222_p3), %vm305_vm2, %v2300_v4 }
   0xe   : > { %318 = vst.msk [vmem:[#allocation2 + $0x60] sm:$0xff] %vm305_vm2, %v2300_v4  ;;  %319 = vst.msk [vmem:[#allocation2 + $0x68] sm:$0xff] %vm305_vm2, %v2300_v4  ;;  %s3031_s21 = smov (!%p2354_p4, %s1912_s21), 2047 }
   0xf   : > { %320 = vst.msk [vmem:[#allocation2 + $0x70] sm:$0xff] %vm305_vm2, %v2300_v4  ;;  %321 = vst.msk [vmem:[#allocation2 + $0x78] sm:$0xff] %vm305_vm2, %v2300_v4  ;;  %s1913_s23 = sshll.u32 %s3031_s21, 2  ;;  %v372_v38 = vld [vmem:[#allocation2 + $0x10] sm:$0xff]  ;;  %v370_v40 = vld [vmem:[#allocation2] sm:$0xff] }
  0x10   : > { %322 = vst.msk [vmem:[#allocation2 + $0x80] sm:$0xff] %vm305_vm2, %v2300_v4  ;;  %323 = vst.msk [vmem:[#allocation2 + $0x88] sm:$0xff] %vm305_vm2, %v2300_v4  ;;  %s2502_s26 = scalar_lea.vmem %s3020_s0, %s1913_s23  ;;  %v373_v43 = vld [vmem:[#allocation2 + $0x18] sm:$0xff]  ;;  %v371_v48 = vld [vmem:[#allocation2 + $0x8] sm:$0xff]  ;;  %s2612_s7 = scalar_lea.vmem %s3024_s4, %s1913_s23 }
  0x11   : > { %324 = vst.msk [vmem:[#allocation2 + $0x90] sm:$0xff] %vm305_vm2, %v2300_v4  ;;  %325 = vst.msk [vmem:[#allocation2 + $0x98] sm:$0xff] %vm305_vm2, %v2300_v4  ;;  %v2241_v6 = vld [vmem:[%s2502_s26] sm:$0xff]   ;;  %v2243_v8 = vld [vmem:[%s2502_s26 + $0x8] sm:$0xff]  }
  0x12   : > { %326 = vst.msk [vmem:[#allocation2 + $0xa0] sm:$0xff] %vm305_vm2, %v2300_v4  ;;  %327 = vst.msk [vmem:[#allocation2 + $0xa8] sm:$0xff] %vm305_vm2, %v2300_v4  ;;  %v2242_v7 = vld [vmem:[%s2502_s26 + $0x80] sm:$0xff]   ;;  %2148 = vmatprep.mubr.msk.bf16.mxu0 %vm665_vm3, %v2241_v6  ;;  %v2244_v9 = vld [vmem:[%s2502_s26 + $0x88] sm:$0xff]  }
  0x13   : > { %328 = vst.msk [vmem:[#allocation2 + $0xb0] sm:$0xff] %vm305_vm2, %v2300_v4  ;;  %329 = vst.msk [vmem:[#allocation2 + $0xb8] sm:$0xff] %vm305_vm2, %v2300_v4  ;;  %2180 = vmatprep.mubr.msk.bf16.mxu1 %vm665_vm3, %v2242_v7  ;;  %2149 = vmatmul.mubr.msk.bf16.vlgmr.msra.gmra.mrb[0].mxu0 %vm665_vm3, %v2243_v8  ;;  %v2245_v10 = vld [vmem:[%s2502_s26 + $0x10] sm:$0xff]   ;;  %v2247_v12 = vld [vmem:[%s2502_s26 + $0x18] sm:$0xff]  }
  0x14   : > { %330 = vst.msk [vmem:[#allocation2 + $0xc0] sm:$0xff] %vm305_vm2, %v2300_v4  ;;  %331 = vst.msk [vmem:[#allocation2 + $0xc8] sm:$0xff] %vm305_vm2, %v2300_v4  ;;  %2181 = vmatmul.mubr.msk.bf16.vlgmr.msra.gmra.mrb[0].mxu1 %vm665_vm3, %v2244_v9  ;;  %v2246_v11 = vld [vmem:[%s2502_s26 + $0x90] sm:$0xff]   ;;  %2152 = vmatprep.mubr.msk.bf16.mxu0 %vm665_vm3, %v2245_v10  ;;  %v2248_v13 = vld [vmem:[%s2502_s26 + $0x98] sm:$0xff]  }
  0x15   : > { %332 = vst.msk [vmem:[#allocation2 + $0xd0] sm:$0xff] %vm305_vm2, %v2300_v4  ;;  %333 = vst.msk [vmem:[#allocation2 + $0xd8] sm:$0xff] %vm305_vm2, %v2300_v4  ;;  %2184 = vmatprep.mubr.msk.bf16.mxu1 %vm665_vm3, %v2246_v11  ;;  %v2249_v14 = vld [vmem:[%s2502_s26 + $0x20] sm:$0xff]   ;;  %v2251_v16 = vld [vmem:[%s2502_s26 + $0x28] sm:$0xff]  }
  0x16   : > { %334 = vst.msk [vmem:[#allocation2 + $0xe0] sm:$0xff] %vm305_vm2, %v2300_v4  ;;  %335 = vst.msk [vmem:[#allocation2 + $0xe8] sm:$0xff] %vm305_vm2, %v2300_v4  ;;  %v2250_v15 = vld [vmem:[%s2502_s26 + $0xa0] sm:$0xff]   ;;  %v2252_v17 = vld [vmem:[%s2502_s26 + $0xa8] sm:$0xff]  }
  0x17   : > { %336 = vst.msk [vmem:[#allocation2 + $0xf0] sm:$0xff] %vm305_vm2, %v2300_v4  ;;  %337 = vst.msk [vmem:[#allocation2 + $0xf8] sm:$0xff] %vm305_vm2, %v2300_v4  ;;  %v2253_v18 = vld [vmem:[%s2502_s26 + $0x30] sm:$0xff]   ;;  %v2255_v20 = vld [vmem:[%s2502_s26 + $0x38] sm:$0xff]  }
  0x18   : > { %338 = vst.msk [vmem:[#allocation2 + $0x100] sm:$0xff] %vm305_vm2, %v2300_v4  ;;  %339 = vst.msk [vmem:[#allocation2 + $0x108] sm:$0xff] %vm305_vm2, %v2300_v4  ;;  %v2254_v19 = vld [vmem:[%s2502_s26 + $0xb0] sm:$0xff]   ;;  %v2256_v21 = vld [vmem:[%s2502_s26 + $0xb8] sm:$0xff]  }
  0x19   : > { %340 = vst.msk [vmem:[#allocation2 + $0x110] sm:$0xff] %vm305_vm2, %v2300_v4  ;;  %341 = vst.msk [vmem:[#allocation2 + $0x118] sm:$0xff] %vm305_vm2, %v2300_v4  ;;  %v2257_v22 = vld [vmem:[%s2502_s26 + $0x40] sm:$0xff]   ;;  %v2259_v24 = vld [vmem:[%s2502_s26 + $0x48] sm:$0xff]  }
  0x1a   : > { %342 = vst.msk [vmem:[#allocation2 + $0x120] sm:$0xff] %vm305_vm2, %v2300_v4  ;;  %343 = vst.msk [vmem:[#allocation2 + $0x128] sm:$0xff] %vm305_vm2, %v2300_v4  ;;  %v2258_v23 = vld [vmem:[%s2502_s26 + $0xc0] sm:$0xff]   ;;  %v2260_v25 = vld [vmem:[%s2502_s26 + $0xc8] sm:$0xff]  }
  0x1b   : > { %344 = vst.msk [vmem:[#allocation2 + $0x130] sm:$0xff] %vm305_vm2, %v2300_v4  ;;  %345 = vst.msk [vmem:[#allocation2 + $0x138] sm:$0xff] %vm305_vm2, %v2300_v4  ;;  %2153 = vmatmul.mubr.msk.bf16.gmra.mrb[4].mxu0 %vm665_vm3, %v2247_v12  ;;  %v2261_v26 = vld [vmem:[%s2502_s26 + $0x50] sm:$0xff]   ;;  %v2263_v28 = vld [vmem:[%s2502_s26 + $0x58] sm:$0xff]  }
  0x1c   : > { %346 = vst.msk [vmem:[#allocation2 + $0x140] sm:$0xff] %vm305_vm2, %v2300_v4  ;;  %347 = vst.msk [vmem:[#allocation2 + $0x148] sm:$0xff] %vm305_vm2, %v2300_v4  ;;  %2185 = vmatmul.mubr.msk.bf16.gmra.mrb[4].mxu1 %vm665_vm3, %v2248_v13  ;;  %2156 = vmatprep.mubr.msk.bf16.mxu0 %vm665_vm3, %v2249_v14  ;;  %v2262_v27 = vld [vmem:[%s2502_s26 + $0xd0] sm:$0xff]   ;;  %v2264_v29 = vld [vmem:[%s2502_s26 + $0xd8] sm:$0xff]  }
  0x1d   : > { %348 = vst.msk [vmem:[#allocation2 + $0x150] sm:$0xff] %vm305_vm2, %v2300_v4  ;;  %349 = vst.msk [vmem:[#allocation2 + $0x158] sm:$0xff] %vm305_vm2, %v2300_v4  ;;  %2188 = vmatprep.mubr.msk.bf16.mxu1 %vm665_vm3, %v2250_v15  ;;  %v2265_v30 = vld [vmem:[%s2502_s26 + $0x60] sm:$0xff]   ;;  %v2267_v32 = vld [vmem:[%s2502_s26 + $0x68] sm:$0xff]  }
  0x1e   : > { %350 = vst.msk [vmem:[#allocation2 + $0x160] sm:$0xff] %vm305_vm2, %v2300_v4  ;;  %351 = vst.msk [vmem:[#allocation2 + $0x168] sm:$0xff] %vm305_vm2, %v2300_v4  ;;  %v2266_v31 = vld [vmem:[%s2502_s26 + $0xe0] sm:$0xff]   ;;  %v2268_v33 = vld [vmem:[%s2502_s26 + $0xe8] sm:$0xff]  }
  0x1f   : > { %352 = vst.msk [vmem:[#allocation2 + $0x170] sm:$0xff] %vm305_vm2, %v2300_v4  ;;  %353 = vst.msk [vmem:[#allocation2 + $0x178] sm:$0xff] %vm305_vm2, %v2300_v4  ;;  %v2269_v34 = vld [vmem:[%s2502_s26 + $0x70] sm:$0xff]   ;;  %v2271_v36 = vld [vmem:[%s2502_s26 + $0x78] sm:$0xff]  }
  0x20   : > { %354 = vst.msk [vmem:[#allocation2 + $0x180] sm:$0xff] %vm305_vm2, %v2300_v4  ;;  %355 = vst.msk [vmem:[#allocation2 + $0x188] sm:$0xff] %vm305_vm2, %v2300_v4  ;;  %v2270_v35 = vld [vmem:[%s2502_s26 + $0xf0] sm:$0xff]   ;;  %v2272_v37 = vld [vmem:[%s2502_s26 + $0xf8] sm:$0xff]  }
  0x21   : > { %356 = vst.msk [vmem:[#allocation2 + $0x190] sm:$0xff] %vm305_vm2, %v2300_v4  ;;  %357 = vst.msk [vmem:[#allocation2 + $0x198] sm:$0xff] %vm305_vm2, %v2300_v4  ;;  %v404_v39 = vld [vmem:[#allocation2 + $0x110] sm:$0xff]  ;;  %v402_v42 = vld [vmem:[#allocation2 + $0x100] sm:$0xff] }
  0x22   : > { %358 = vst.msk [vmem:[#allocation2 + $0x1a0] sm:$0xff] %vm305_vm2, %v2300_v4  ;;  %359 = vst.msk [vmem:[#allocation2 + $0x1a8] sm:$0xff] %vm305_vm2, %v2300_v4  ;;  %v405_v47 = vld [vmem:[#allocation2 + $0x118] sm:$0xff]  ;;  %v403_v53 = vld [vmem:[#allocation2 + $0x108] sm:$0xff] }
  0x23   : > { %360 = vst.msk [vmem:[#allocation2 + $0x1b0] sm:$0xff] %vm305_vm2, %v2300_v4  ;;  %361 = vst.msk [vmem:[#allocation2 + $0x1b8] sm:$0xff] %vm305_vm2, %v2300_v4  ;;  %2157 = vmatmul.mubr.msk.bf16.gmra.mrb[8].mxu0 %vm665_vm3, %v2251_v16  ;;  %v376_v62 = vld [vmem:[#allocation2 + $0x30] sm:$0xff]  ;;  %v374_v0 = vld [vmem:[#allocation2 + $0x20] sm:$0xff] }
  0x24   : > { %362 = vst.msk [vmem:[#allocation2 + $0x1c0] sm:$0xff] %vm305_vm2, %v2300_v4  ;;  %363 = vst.msk [vmem:[#allocation2 + $0x1c8] sm:$0xff] %vm305_vm2, %v2300_v4  ;;  %2189 = vmatmul.mubr.msk.bf16.gmra.mrb[8].mxu1 %vm665_vm3, %v2252_v17  ;;  %2160 = vmatprep.mubr.msk.bf16.mxu0 %vm665_vm3, %v2253_v18  ;;  %v408_v63 = vld [vmem:[#allocation2 + $0x130] sm:$0xff]  ;;  %v406_v3 = vld [vmem:[#allocation2 + $0x120] sm:$0xff] }
  0x25   : > { %364 = vst.msk [vmem:[#allocation2 + $0x1d0] sm:$0xff] %vm305_vm2, %v2300_v4  ;;  %365 = vst.msk [vmem:[#allocation2 + $0x1d8] sm:$0xff] %vm305_vm2, %v2300_v4  ;;  %2192 = vmatprep.mubr.msk.bf16.mxu1 %vm665_vm3, %v2254_v19  ;;  %v409_v8 = vld [vmem:[#allocation2 + $0x138] sm:$0xff]  ;;  %v375_v9 = vld [vmem:[#allocation2 + $0x28] sm:$0xff] }
  0x26   : > { %366 = vst.msk [vmem:[#allocation2 + $0x1e0] sm:$0xff] %vm305_vm2, %v2300_v4  ;;  %367 = vst.msk [vmem:[#allocation2 + $0x1e8] sm:$0xff] %vm305_vm2, %v2300_v4  ;;  %v2584_v11 = vld [vmem:[%s3023_s3] ss:$0 sm:$0xff]  ;;  %v407_v16 = vld [vmem:[#allocation2 + $0x128] sm:$0xff] }
  0x27   : > { %368 = vst.msk [vmem:[#allocation2 + $0x1f0] sm:$0xff] %vm305_vm2, %v2300_v4  ;;  %369 = vst.msk [vmem:[#allocation2 + $0x1f8] sm:$0xff] %vm305_vm2, %v2300_v4  ;;  %v377_v4 = vld [vmem:[#allocation2 + $0x38] sm:$0xff] }
  0x2b   : > { %2161 = vmatmul.mubr.msk.bf16.gmra.mrb[12].mxu0 %vm665_vm3, %v2255_v20 }
  0x2c   : > { %2193 = vmatmul.mubr.msk.bf16.gmra.mrb[12].mxu1 %vm665_vm3, %v2256_v21  ;;  %2164 = vmatprep.mubr.msk.bf16.mxu0 %vm665_vm3, %v2257_v22 }
  0x2d   : > { %2196 = vmatprep.mubr.msk.bf16.mxu1 %vm665_vm3, %v2258_v23 }
  0x33   : > { %2165 = vmatmul.mubr.msk.bf16.gmra.mrb[16].mxu0 %vm665_vm3, %v2259_v24 }
  0x34   : > { %2197 = vmatmul.mubr.msk.bf16.gmra.mrb[16].mxu1 %vm665_vm3, %v2260_v25  ;;  %2168 = vmatprep.mubr.msk.bf16.mxu0 %vm665_vm3, %v2261_v26 }
  0x35   : > { %2200 = vmatprep.mubr.msk.bf16.mxu1 %vm665_vm3, %v2262_v27 }
  0x3b   : > { %2169 = vmatmul.mubr.msk.bf16.gmra.mrb[20].mxu0 %vm665_vm3, %v2263_v28 }
  0x3c   : > { %2201 = vmatmul.mubr.msk.bf16.gmra.mrb[20].mxu1 %vm665_vm3, %v2264_v29  ;;  %2172 = vmatprep.mubr.msk.bf16.mxu0 %vm665_vm3, %v2265_v30 }
  0x3d   : > { %2204 = vmatprep.mubr.msk.bf16.mxu1 %vm665_vm3, %v2266_v31 }
  0x43   : > { %2173 = vmatmul.mubr.msk.bf16.gmra.mrb[24].mxu0 %vm665_vm3, %v2267_v32 }
  0x44   : > { %2205 = vmatmul.mubr.msk.bf16.gmra.mrb[24].mxu1 %vm665_vm3, %v2268_v33  ;;  %2176 = vmatprep.mubr.msk.bf16.mxu0 %vm665_vm3, %v2269_v34 }
  0x45   : > { %2208 = vmatprep.mubr.msk.bf16.mxu1 %vm665_vm3, %v2270_v35 }
  0x4b   : > { %2177 = vmatmul.mubr.msk.bf16.gmra.mrb[28].mxu0 %vm665_vm3, %v2271_v36 }
  0x4c   : > { %2209 = vmatmul.mubr.msk.bf16.gmra.mrb[28].mxu1 %vm665_vm3, %v2272_v37 }
  0xe6   : > { %v2150_v41 = vpop.f32.mrb[0].mxu0 }
  0xe7   : > { %v1060_v44 = vadd.f32 %v2150_v41, %v372_v38  ;;  %v2182_v45 = vpop.f32.mrb[0].mxu1  ;;  %v803_v46 = vpop.f32.mrb[1].mxu0 }
  0xe8   : > { %v1092_v49 = vadd.f32 %v2182_v45, %v404_v39  ;;  %v1058_v50 = vadd.f32 %v803_v46, %v370_v40  ;;  %v931_v51 = vpop.f32.mrb[1].mxu1  ;;  %v2151_v52 = vpop.f32.mrb[2].mxu0 }
  0xe9   : > { %1125 = vst.msk [vmem:[#allocation2 + $0x10] sm:$0xff] %vm305_vm2, %v1060_v44  ;;  %v1090_v54 = vadd.f32 %v931_v51, %v402_v42  ;;  %v1061_v55 = vadd.f32 %v2151_v52, %v373_v43  ;;  %v2183_v56 = vpop.f32.mrb[2].mxu1  ;;  %v806_v57 = vpop.f32.mrb[3].mxu0 }
  0xea   : > { %1157 = vst.msk [vmem:[#allocation2 + $0x110] sm:$0xff] %vm305_vm2, %v1092_v49  ;;  %1123 = vst.msk [vmem:[#allocation2] sm:$0xff] %vm305_vm2, %v1058_v50  ;;  %v1093_v58 = vadd.f32 %v2183_v56, %v405_v47  ;;  %v1059_v59 = vadd.f32 %v806_v57, %v371_v48  ;;  %v934_v60 = vpop.f32.mrb[3].mxu1 }
  0xeb   : > { %1155 = vst.msk [vmem:[#allocation2 + $0x100] sm:$0xff] %vm305_vm2, %v1090_v54  ;;  %1126 = vst.msk [vmem:[#allocation2 + $0x18] sm:$0xff] %vm305_vm2, %v1061_v55  ;;  %v1091_v61 = vadd.f32 %v934_v60, %v403_v53 }
  0xec   : > { %1158 = vst.msk [vmem:[#allocation2 + $0x118] sm:$0xff] %vm305_vm2, %v1093_v58  ;;  %1124 = vst.msk [vmem:[#allocation2 + $0x8] sm:$0xff] %vm305_vm2, %v1059_v59 }
  0xed   : > { %1156 = vst.msk [vmem:[#allocation2 + $0x108] sm:$0xff] %vm305_vm2, %v1091_v61 }
  0xee   : > { %v2154_v2 = vpop.f32.mrb[4].mxu0 }
  0xef   : > { %v1064_v5 = vadd.f32 %v2154_v2, %v376_v62  ;;  %v2186_v6 = vpop.f32.mrb[4].mxu1  ;;  %v819_v7 = vpop.f32.mrb[5].mxu0 }
  0xf0   : > { %v1192_v10 = vld [vmem:[#allocation2 + $0x10] sm:$0xff]  ;;  %v1096_v12 = vadd.f32 %v2186_v6, %v408_v63  ;;  %v1062_v13 = vadd.f32 %v819_v7, %v374_v0  ;;  %v947_v14 = vpop.f32.mrb[5].mxu1  ;;  %v2155_v15 = vpop.f32.mrb[6].mxu0 }
  0xf1   : > { %v1263_v17 = vmul.f32 %v2579_v1, %v1192_v10  ;;  %v1224_v18 = vld [vmem:[#allocation2 + $0x110] sm:$0xff]  ;;  %v1190_v19 = vld [vmem:[#allocation2] sm:$0xff]  ;;  %1129 = vst.msk [vmem:[#allocation2 + $0x30] sm:$0xff] %vm305_vm2, %v1064_v5  ;;  %v1094_v20 = vadd.f32 %v947_v14, %v406_v3  ;;  %v1065_v21 = vadd.f32 %v2155_v15, %v377_v4  ;;  %v2187_v22 = vpop.f32.mrb[6].mxu1  ;;  %v822_v23 = vpop.f32.mrb[7].mxu0 }
  0xf2   : > { %v1295_v24 = vmul.f32 %v2579_v1, %v1224_v18  ;;  %v1261_v25 = vmul.f32 %v2579_v1, %v1190_v19  ;;  %v1222_v26 = vld [vmem:[#allocation2 + $0x100] sm:$0xff]  ;;  %v1193_v27 = vld [vmem:[#allocation2 + $0x18] sm:$0xff]  ;;  %1161 = vst.msk [vmem:[#allocation2 + $0x130] sm:$0xff] %vm305_vm2, %v1096_v12  ;;  %1127 = vst.msk [vmem:[#allocation2 + $0x20] sm:$0xff] %vm305_vm2, %v1062_v13  ;;  %v1097_v28 = vadd.f32 %v2187_v22, %v409_v8  ;;  %v950_v30 = vpop.f32.mrb[7].mxu1 }
  0xf3   : > { %v1063_v29 = vadd.f32 %v822_v23, %v375_v9  ;;  %v1334_v31 = vadd.f32 %v2584_v11, %v1263_v17  ;;  %v1293_v32 = vmul.f32 %v2579_v1, %v1222_v26  ;;  %v1264_v33 = vmul.f32 %v2579_v1, %v1193_v27  ;;  %v1225_v34 = vld [vmem:[#allocation2 + $0x118] sm:$0xff]  ;;  %v1191_v35 = vld [vmem:[#allocation2 + $0x8] sm:$0xff]  ;;  %1159 = vst.msk [vmem:[#allocation2 + $0x120] sm:$0xff] %vm305_vm2, %v1094_v20 }
  0xf4   : > { %1130 = vst.msk [vmem:[#allocation2 + $0x38] sm:$0xff] %vm305_vm2, %v1065_v21  ;;  %v1095_v36 = vadd.f32 %v950_v30, %v407_v16  ;;  %v1366_v37 = vadd.f32 %v2584_v11, %v1295_v24  ;;  %v1332_v38 = vadd.f32 %v2584_v11, %v1261_v25  ;;  %v1296_v39 = vmul.f32 %v2579_v1, %v1225_v34  ;;  %v1223_v41 = vld [vmem:[#allocation2 + $0x108] sm:$0xff] }
  0xf5   : > { %v1262_v40 = vmul.f32 %v2579_v1, %v1191_v35  ;;  %1162 = vst.msk [vmem:[#allocation2 + $0x138] sm:$0xff] %vm305_vm2, %v1097_v28  ;;  %1128 = vst.msk [vmem:[#allocation2 + $0x28] sm:$0xff] %vm305_vm2, %v1063_v29  ;;  %v1398_v42 = vmax.f32 %v1334_v31, 0.0  ;;  %v1364_v43 = vadd.f32 %v2584_v11, %v1293_v32  ;;  %v1335_v44 = vadd.f32 %v2584_v11, %v1264_v33  ;;  %v380_v32 = vld [vmem:[#allocation2 + $0x50] sm:$0xff] }
  0xf6   : > { %v1294_v45 = vmul.f32 %v2579_v1, %v1223_v41  ;;  %1160 = vst.msk [vmem:[#allocation2 + $0x128] sm:$0xff] %vm305_vm2, %v1095_v36  ;;  %v1430_v46 = vmax.f32 %v1366_v37, 0.0  ;;  %v1396_v47 = vmax.f32 %v1332_v38, 0.0  ;;  %v1367_v48 = vadd.f32 %v2584_v11, %v1296_v39  ;;  %v2616_v50 = vpop.f32.mrb[8].mxu0  ;;  %v412_v37 = vld [vmem:[#allocation2 + $0x150] sm:$0xff]  ;;  %v378_v38 = vld [vmem:[#allocation2 + $0x40] sm:$0xff] }
  0xf7   : > { %v1333_v49 = vadd.f32 %v2584_v11, %v1262_v40  ;;  %v2051_v51 = vpack.c.bf16 %v1398_v42, %v1398_v42  ;;  %v1428_v52 = vmax.f32 %v1364_v43, 0.0  ;;  %v1399_v53 = vmax.f32 %v1335_v44, 0.0  ;;  %v2619_v55 = vpop.f32.mrb[8].mxu1  ;;  %v2621_v56 = vpop.f32.mrb[9].mxu0  ;;  %v410_v39 = vld [vmem:[#allocation2 + $0x140] sm:$0xff] }
  0xf8   : > { %v1365_v54 = vadd.f32 %v2584_v11, %v1294_v45  ;;  %v2083_v57 = vpack.c.bf16 %v1430_v46, %v1430_v46  ;;  %v2049_v58 = vpack.c.bf16 %v1396_v47, %v1396_v47  ;;  %v1431_v59 = vmax.f32 %v1367_v48, 0.0  ;;  %v1196_v61 = vld [vmem:[#allocation2 + $0x30] sm:$0xff]  ;;  %v2623_v62 = vpop.f32.mrb[9].mxu1  ;;  %v2625_v63 = vpop.f32.mrb[10].mxu0  ;;  %v381_v45 = vld [vmem:[#allocation2 + $0x58] sm:$0xff] }
  0xf9   : > { %v1397_v60 = vmax.f32 %v1333_v49, 0.0  ;;  %1719 = vst.msk [vmem:[%s2612_s7 + $0x8] sm:$0xf] %vm1716_vm4, %v2051_v51  ;;  %v2081_v0 = vpack.c.bf16 %v1428_v52, %v1428_v52  ;;  %v2052_v2 = vpack.c.bf16 %v1399_v53, %v1399_v53  ;;  %v1267_v4 = vmul.f32 %v2579_v1, %v1196_v61  ;;  %v1228_v5 = vld [vmem:[#allocation2 + $0x130] sm:$0xff]  ;;  %v1194_v6 = vld [vmem:[#allocation2 + $0x20] sm:$0xff]  ;;  %v2630_v7 = vpop.f32.mrb[10].mxu1 }
  0xfa   : > { %v1429_v3 = vmax.f32 %v1365_v54, 0.0  ;;  %v2632_v8 = vpop.f32.mrb[11].mxu0  ;;  %1751 = vst.msk [vmem:[%s2612_s7 + $0x88] sm:$0xf] %vm1716_vm4, %v2083_v57  ;;  %1717 = vst.msk [vmem:[%s2612_s7] sm:$0xf] %vm1716_vm4, %v2049_v58  ;;  %v2084_v9 = vpack.c.bf16 %v1431_v59, %v1431_v59  ;;  %v1299_v12 = vmul.f32 %v2579_v1, %v1228_v5  ;;  %v1265_v13 = vmul.f32 %v2579_v1, %v1194_v6 }
  0xfb   : > { %v2050_v10 = vpack.c.bf16 %v1397_v60, %v1397_v60  ;;  %v1226_v14 = vld [vmem:[#allocation2 + $0x120] sm:$0xff]  ;;  %v1197_v15 = vld [vmem:[#allocation2 + $0x38] sm:$0xff]  ;;  %v2640_v16 = vpop.f32.mrb[11].mxu1  ;;  %1749 = vst.msk [vmem:[%s2612_s7 + $0x80] sm:$0xf] %vm1716_vm4, %v2081_v0  ;;  %v1338_v18 = vadd.f32 %v2584_v11, %v1267_v4  ;;  %v379_v54 = vld [vmem:[#allocation2 + $0x48] sm:$0xff] }
  0xfc   : > { %1720 = vst.msk [vmem:[%s2612_s7 + $0xc] sm:$0xf] %vm1716_vm4, %v2052_v2  ;;  %v2082_v17 = vpack.c.bf16 %v1429_v3, %v1429_v3  ;;  %v1297_v19 = vmul.f32 %v2579_v1, %v1226_v14  ;;  %v1268_v20 = vmul.f32 %v2579_v1, %v1197_v15  ;;  %v1229_v21 = vld [vmem:[#allocation2 + $0x138] sm:$0xff]  ;;  %v1195_v22 = vld [vmem:[#allocation2 + $0x28] sm:$0xff]  ;;  %1752 = vst.msk [vmem:[%s2612_s7 + $0x8c] sm:$0xf] %vm1716_vm4, %v2084_v9 }
  0xfd   : > { %1718 = vst.msk [vmem:[%s2612_s7 + $0x4] sm:$0xf] %vm1716_vm4, %v2050_v10  ;;  %v1370_v23 = vadd.f32 %v2584_v11, %v1299_v12  ;;  %v1336_v24 = vadd.f32 %v2584_v11, %v1265_v13  ;;  %v1300_v25 = vmul.f32 %v2579_v1, %v1229_v21  ;;  %v1266_v26 = vmul.f32 %v2579_v1, %v1195_v22  ;;  %v1227_v27 = vld [vmem:[#allocation2 + $0x128] sm:$0xff]  ;;  %v413_v46 = vld [vmem:[#allocation2 + $0x158] sm:$0xff]  ;;  %v384_v3 = vld [vmem:[#allocation2 + $0x70] sm:$0xff] }
  0xfe   : > { %1750 = vst.msk [vmem:[%s2612_s7 + $0x84] sm:$0xf] %vm1716_vm4, %v2082_v17  ;;  %v1402_v28 = vmax.f32 %v1338_v18, 0.0  ;;  %v1368_v29 = vadd.f32 %v2584_v11, %v1297_v19  ;;  %v1339_v30 = vadd.f32 %v2584_v11, %v1268_v20  ;;  %v1298_v31 = vmul.f32 %v2579_v1, %v1227_v27  ;;  %v2162_v40 = vpop.f32.mrb[12].mxu0  ;;  %v411_v57 = vld [vmem:[#allocation2 + $0x148] sm:$0xff]  ;;  %v416_v4 = vld [vmem:[#allocation2 + $0x170] sm:$0xff] }
  0xff   : > { %v1434_v33 = vmax.f32 %v1370_v23, 0.0  ;;  %v1400_v34 = vmax.f32 %v1336_v24, 0.0  ;;  %v1371_v35 = vadd.f32 %v2584_v11, %v1300_v25  ;;  %v1337_v36 = vadd.f32 %v2584_v11, %v1266_v26  ;;  %v2194_v47 = vpop.f32.mrb[12].mxu1  ;;  %v851_v48 = vpop.f32.mrb[13].mxu0  ;;  %v382_v5 = vld [vmem:[#allocation2 + $0x60] sm:$0xff]  ;;  %v385_v15 = vld [vmem:[#allocation2 + $0x78] sm:$0xff] }
 0x100   : > { %v2055_v41 = vpack.c.bf16 %v1402_v28, %v1402_v28  ;;  %v1432_v42 = vmax.f32 %v1368_v29, 0.0  ;;  %v1403_v43 = vmax.f32 %v1339_v30, 0.0  ;;  %v1369_v44 = vadd.f32 %v2584_v11, %v1298_v31  ;;  %v979_v58 = vpop.f32.mrb[13].mxu1  ;;  %v2163_v59 = vpop.f32.mrb[14].mxu0  ;;  %v417_v17 = vld [vmem:[#allocation2 + $0x178] sm:$0xff]  ;;  %v383_v22 = vld [vmem:[#allocation2 + $0x68] sm:$0xff] }
 0x101   : > { %v2087_v49 = vpack.c.bf16 %v1434_v33, %v1434_v33  ;;  %v2053_v51 = vpack.c.bf16 %v1400_v34, %v1400_v34  ;;  %v1435_v52 = vmax.f32 %v1371_v35, 0.0  ;;  %v1401_v53 = vmax.f32 %v1337_v36, 0.0  ;;  %v2195_v6 = vpop.f32.mrb[14].mxu1  ;;  %v854_v9 = vpop.f32.mrb[15].mxu0  ;;  %v388_v26 = vld [vmem:[#allocation2 + $0x90] sm:$0xff]  ;;  %v386_v30 = vld [vmem:[#allocation2 + $0x80] sm:$0xff] }
 0x102   : > { %1723 = vst.msk [vmem:[%s2612_s7 + $0x18] sm:$0xf] %vm1716_vm4, %v2055_v41  ;;  %v2085_v60 = vpack.c.bf16 %v1432_v42, %v1432_v42  ;;  %v2056_v61 = vpack.c.bf16 %v1403_v43, %v1403_v43  ;;  %v1433_v0 = vmax.f32 %v1369_v44, 0.0  ;;  %v1068_v2 = vadd.f32 %v2616_v50, %v380_v32  ;;  %v414_v50 = vld [vmem:[#allocation2 + $0x160] sm:$0xff]  ;;  %v982_v18 = vpop.f32.mrb[15].mxu1  ;;  %v420_v29 = vld [vmem:[#allocation2 + $0x190] sm:$0xff] }
 0x103   : > { %1755 = vst.msk [vmem:[%s2612_s7 + $0x98] sm:$0xf] %vm1716_vm4, %v2087_v49  ;;  %1721 = vst.msk [vmem:[%s2612_s7 + $0x10] sm:$0xf] %vm1716_vm4, %v2053_v51  ;;  %v2088_v10 = vpack.c.bf16 %v1435_v52, %v1435_v52  ;;  %v2054_v12 = vpack.c.bf16 %v1401_v53, %v1401_v53  ;;  %v1100_v13 = vadd.f32 %v2619_v55, %v412_v37  ;;  %v418_v32 = vld [vmem:[#allocation2 + $0x180] sm:$0xff]  ;;  %v389_v33 = vld [vmem:[#allocation2 + $0x98] sm:$0xff] }
 0x104   : > { %v1066_v14 = vadd.f32 %v2621_v56, %v378_v38  ;;  %1753 = vst.msk [vmem:[%s2612_s7 + $0x90] sm:$0xf] %vm1716_vm4, %v2085_v60  ;;  %1724 = vst.msk [vmem:[%s2612_s7 + $0x1c] sm:$0xf] %vm1716_vm4, %v2056_v61  ;;  %v2086_v19 = vpack.c.bf16 %v1433_v0, %v1433_v0  ;;  %v1098_v20 = vadd.f32 %v2623_v62, %v410_v39  ;;  %v415_v56 = vld [vmem:[#allocation2 + $0x168] sm:$0xff]  ;;  %v421_v37 = vld [vmem:[#allocation2 + $0x198] sm:$0xff] }
 0x105   : > { %1133 = vst.msk [vmem:[#allocation2 + $0x50] sm:$0xff] %vm305_vm2, %v1068_v2  ;;  %v1069_v21 = vadd.f32 %v2625_v63, %v381_v45  ;;  %v1101_v55 = vadd.f32 %v2630_v7, %v413_v46  ;;  %1165 = vst.msk [vmem:[#allocation2 + $0x150] sm:$0xff] %vm305_vm2, %v1100_v13  ;;  %v1067_v23 = vadd.f32 %v2632_v8, %v379_v54  ;;  %v387_v38 = vld [vmem:[#allocation2 + $0x88] sm:$0xff] }
 0x106   : > { %1756 = vst.msk [vmem:[%s2612_s7 + $0x9c] sm:$0xf] %vm1716_vm4, %v2088_v10  ;;  %1722 = vst.msk [vmem:[%s2612_s7 + $0x14] sm:$0xf] %vm1716_vm4, %v2054_v12  ;;  %v1099_v24 = vadd.f32 %v2640_v16, %v411_v57  ;;  %v1072_v25 = vadd.f32 %v2162_v40, %v384_v3  ;;  %v1104_v62 = vadd.f32 %v2194_v47, %v416_v4  ;;  %v2166_v31 = vpop.f32.mrb[16].mxu0  ;;  %v419_v43 = vld [vmem:[#allocation2 + $0x188] sm:$0xff] }
 0x107   : > { %1131 = vst.msk [vmem:[#allocation2 + $0x40] sm:$0xff] %vm305_vm2, %v1066_v14  ;;  %1163 = vst.msk [vmem:[#allocation2 + $0x140] sm:$0xff] %vm305_vm2, %v1098_v20  ;;  %v1070_v63 = vadd.f32 %v851_v48, %v382_v5  ;;  %v1102_v7 = vadd.f32 %v979_v58, %v414_v50  ;;  %v1073_v27 = vadd.f32 %v2163_v59, %v385_v15  ;;  %v2198_v35 = vpop.f32.mrb[16].mxu1  ;;  %v867_v36 = vpop.f32.mrb[17].mxu0 }
 0x108   : > { %1754 = vst.msk [vmem:[%s2612_s7 + $0x94] sm:$0xf] %vm1716_vm4, %v2086_v19  ;;  %v1105_v28 = vadd.f32 %v2195_v6, %v417_v17  ;;  %v1071_v8 = vadd.f32 %v854_v9, %v383_v22  ;;  %v1103_v16 = vadd.f32 %v982_v18, %v415_v56  ;;  %v1076_v34 = vadd.f32 %v2166_v31, %v388_v26  ;;  %v995_v41 = vpop.f32.mrb[17].mxu1  ;;  %v2167_v42 = vpop.f32.mrb[18].mxu0 }
 0x109   : > { %1134 = vst.msk [vmem:[#allocation2 + $0x58] sm:$0xff] %vm305_vm2, %v1069_v21  ;;  %1166 = vst.msk [vmem:[#allocation2 + $0x158] sm:$0xff] %vm305_vm2, %v1101_v55  ;;  %v1108_v39 = vadd.f32 %v2198_v35, %v420_v29  ;;  %v1074_v40 = vadd.f32 %v867_v36, %v386_v30  ;;  %v1106_v44 = vadd.f32 %v995_v41, %v418_v32  ;;  %v2199_v46 = vpop.f32.mrb[18].mxu1  ;;  %v870_v47 = vpop.f32.mrb[19].mxu0 }
 0x10a   : > { %1132 = vst.msk [vmem:[#allocation2 + $0x48] sm:$0xff] %vm305_vm2, %v1067_v23  ;;  %1164 = vst.msk [vmem:[#allocation2 + $0x148] sm:$0xff] %vm305_vm2, %v1099_v24  ;;  %v1077_v45 = vadd.f32 %v2167_v42, %v389_v33  ;;  %v1109_v49 = vadd.f32 %v2199_v46, %v421_v37  ;;  %v1075_v51 = vadd.f32 %v870_v47, %v387_v38  ;;  %v998_v52 = vpop.f32.mrb[19].mxu1 }
 0x10b   : > { %1137 = vst.msk [vmem:[#allocation2 + $0x70] sm:$0xff] %vm305_vm2, %v1072_v25  ;;  %1169 = vst.msk [vmem:[#allocation2 + $0x170] sm:$0xff] %vm305_vm2, %v1104_v62  ;;  %v1107_v58 = vadd.f32 %v998_v52, %v419_v43 }
 0x10c   : > { %1135 = vst.msk [vmem:[#allocation2 + $0x60] sm:$0xff] %vm305_vm2, %v1070_v63  ;;  %1167 = vst.msk [vmem:[#allocation2 + $0x160] sm:$0xff] %vm305_vm2, %v1102_v7  ;;  %v1200_v48 = vld [vmem:[#allocation2 + $0x50] sm:$0xff] }
 0x10d   : > { %1138 = vst.msk [vmem:[#allocation2 + $0x78] sm:$0xff] %vm305_vm2, %v1073_v27  ;;  %1170 = vst.msk [vmem:[#allocation2 + $0x178] sm:$0xff] %vm305_vm2, %v1105_v28  ;;  %v1271_v53 = vmul.f32 %v2579_v1, %v1200_v48  ;;  %v1232_v54 = vld [vmem:[#allocation2 + $0x150] sm:$0xff] }
 0x10e   : > { %1136 = vst.msk [vmem:[#allocation2 + $0x68] sm:$0xff] %vm305_vm2, %v1071_v8  ;;  %1168 = vst.msk [vmem:[#allocation2 + $0x168] sm:$0xff] %vm305_vm2, %v1103_v16  ;;  %v1198_v57 = vld [vmem:[#allocation2 + $0x40] sm:$0xff]  ;;  %v1303_v59 = vmul.f32 %v2579_v1, %v1232_v54  ;;  %v2724_v15 = vpop.f32.mrb[20].mxu0 }
 0x10f   : > { %1141 = vst.msk [vmem:[#allocation2 + $0x90] sm:$0xff] %vm305_vm2, %v1076_v34  ;;  %1173 = vst.msk [vmem:[#allocation2 + $0x190] sm:$0xff] %vm305_vm2, %v1108_v39  ;;  %v1269_v60 = vmul.f32 %v2579_v1, %v1198_v57  ;;  %v1230_v61 = vld [vmem:[#allocation2 + $0x140] sm:$0xff]  ;;  %v1342_v3 = vadd.f32 %v2584_v11, %v1271_v53  ;;  %v2729_v21 = vpop.f32.mrb[20].mxu1  ;;  %v2731_v55 = vpop.f32.mrb[21].mxu0 }
 0x110   : > { %1139 = vst.msk [vmem:[#allocation2 + $0x80] sm:$0xff] %vm305_vm2, %v1074_v40  ;;  %1171 = vst.msk [vmem:[#allocation2 + $0x180] sm:$0xff] %vm305_vm2, %v1106_v44  ;;  %v1201_v0 = vld [vmem:[#allocation2 + $0x58] sm:$0xff]  ;;  %v1301_v4 = vmul.f32 %v2579_v1, %v1230_v61  ;;  %v1374_v12 = vadd.f32 %v2584_v11, %v1303_v59  ;;  %v2735_v26 = vpop.f32.mrb[21].mxu1  ;;  %v2737_v63 = vpop.f32.mrb[22].mxu0 }
 0x111   : > { %1142 = vst.msk [vmem:[#allocation2 + $0x98] sm:$0xff] %vm305_vm2, %v1077_v45  ;;  %v1233_v2 = vld [vmem:[#allocation2 + $0x158] sm:$0xff]  ;;  %1174 = vst.msk [vmem:[#allocation2 + $0x198] sm:$0xff] %vm305_vm2, %v1109_v49  ;;  %v1272_v5 = vmul.f32 %v2579_v1, %v1201_v0  ;;  %v1199_v9 = vld [vmem:[#allocation2 + $0x48] sm:$0xff]  ;;  %v1340_v13 = vadd.f32 %v2584_v11, %v1269_v60  ;;  %v1406_v17 = vmax.f32 %v1342_v3, 0.0  ;;  %v2739_v16 = vpop.f32.mrb[22].mxu1 }
 0x112   : > { %1140 = vst.msk [vmem:[#allocation2 + $0x88] sm:$0xff] %vm305_vm2, %v1075_v51  ;;  %v1304_v6 = vmul.f32 %v2579_v1, %v1233_v2  ;;  %v1231_v10 = vld [vmem:[#allocation2 + $0x148] sm:$0xff]  ;;  %1172 = vst.msk [vmem:[#allocation2 + $0x188] sm:$0xff] %vm305_vm2, %v1107_v58  ;;  %v1270_v14 = vmul.f32 %v2579_v1, %v1199_v9  ;;  %v1372_v18 = vadd.f32 %v2584_v11, %v1301_v4  ;;  %v1438_v22 = vmax.f32 %v1374_v12, 0.0  ;;  %v1204_v25 = vld [vmem:[#allocation2 + $0x70] sm:$0xff]  ;;  %v2741_v37 = vpop.f32.mrb[23].mxu0 }
 0x113   : > { %v1302_v50 = vmul.f32 %v2579_v1, %v1231_v10  ;;  %v1343_v19 = vadd.f32 %v2584_v11, %v1272_v5  ;;  %v1404_v56 = vmax.f32 %v1340_v13, 0.0  ;;  %v1236_v62 = vld [vmem:[#allocation2 + $0x170] sm:$0xff]  ;;  %v2059_v7 = vpack.c.bf16 %v1406_v17, %v1406_v17  ;;  %v1202_v30 = vld [vmem:[#allocation2 + $0x60] sm:$0xff]  ;;  %v2743_v38 = vpop.f32.mrb[23].mxu1 }
 0x114   : > { %v1375_v20 = vadd.f32 %v2584_v11, %v1304_v6  ;;  %v1341_v23 = vadd.f32 %v2584_v11, %v1270_v14  ;;  %v1436_v27 = vmax.f32 %v1372_v18, 0.0  ;;  %v1234_v8 = vld [vmem:[#allocation2 + $0x160] sm:$0xff]  ;;  %v2091_v31 = vpack.c.bf16 %v1438_v22, %v1438_v22  ;;  %v1205_v35 = vld [vmem:[#allocation2 + $0x78] sm:$0xff] }
 0x115   : > { %v1373_v24 = vadd.f32 %v2584_v11, %v1302_v50  ;;  %v1407_v28 = vmax.f32 %v1343_v19, 0.0  ;;  %v2057_v32 = vpack.c.bf16 %v1404_v56, %v1404_v56  ;;  %v1237_v36 = vld [vmem:[#allocation2 + $0x178] sm:$0xff]  ;;  %1727 = vst.msk [vmem:[%s2612_s7 + $0x28] sm:$0xf] %vm1716_vm4, %v2059_v7  ;;  %v1275_v42 = vmul.f32 %v2579_v1, %v1204_v25  ;;  %v1203_v43 = vld [vmem:[#allocation2 + $0x68] sm:$0xff] }
 0x116   : > { %v1439_v29 = vmax.f32 %v1375_v20, 0.0  ;;  %v1405_v33 = vmax.f32 %v1341_v23, 0.0  ;;  %v2089_v39 = vpack.c.bf16 %v1436_v27, %v1436_v27  ;;  %v1235_v44 = vld [vmem:[#allocation2 + $0x168] sm:$0xff]  ;;  %1759 = vst.msk [vmem:[%s2612_s7 + $0xa8] sm:$0xf] %vm1716_vm4, %v2091_v31  ;;  %v1307_v47 = vmul.f32 %v2579_v1, %v1236_v62  ;;  %v2772_v60 = vpop.f32.mrb[24].mxu0 }
 0x117   : > { %v1437_v34 = vmax.f32 %v1373_v24, 0.0  ;;  %v2060_v40 = vpack.c.bf16 %v1407_v28, %v1407_v28  ;;  %1725 = vst.msk [vmem:[%s2612_s7 + $0x20] sm:$0xf] %vm1716_vm4, %v2057_v32  ;;  %v1273_v48 = vmul.f32 %v2579_v1, %v1202_v30  ;;  %v1346_v49 = vadd.f32 %v2584_v11, %v1275_v42  ;;  %v2777_v4 = vpop.f32.mrb[24].mxu1  ;;  %v2779_v5 = vpop.f32.mrb[25].mxu0  ;;  %v1208_v13 = vld [vmem:[#allocation2 + $0x90] sm:$0xff] }
 0x118   : > { %v2092_v41 = vpack.c.bf16 %v1439_v29, %v1439_v29  ;;  %v2058_v45 = vpack.c.bf16 %v1405_v33, %v1405_v33  ;;  %1757 = vst.msk [vmem:[%s2612_s7 + $0xa0] sm:$0xf] %vm1716_vm4, %v2089_v39  ;;  %v1305_v51 = vmul.f32 %v2579_v1, %v1234_v8  ;;  %v1276_v52 = vmul.f32 %v2579_v1, %v1205_v35  ;;  %v1240_v14 = vld [vmem:[#allocation2 + $0x190] sm:$0xff]  ;;  %v2783_v50 = vpop.f32.mrb[25].mxu1  ;;  %v2785_v17 = vpop.f32.mrb[26].mxu0  ;;  %v1206_v56 = vld [vmem:[#allocation2 + $0x80] sm:$0xff] }
 0x119   : > { %v2090_v46 = vpack.c.bf16 %v1437_v34, %v1437_v34  ;;  %1728 = vst.msk [vmem:[%s2612_s7 + $0x2c] sm:$0xf] %vm1716_vm4, %v2060_v40  ;;  %v1308_v53 = vmul.f32 %v2579_v1, %v1237_v36  ;;  %v1378_v54 = vadd.f32 %v2584_v11, %v1307_v47  ;;  %v1344_v57 = vadd.f32 %v2584_v11, %v1273_v48  ;;  %v2787_v23 = vpop.f32.mrb[26].mxu1  ;;  %v2789_v24 = vpop.f32.mrb[27].mxu0  ;;  %v1238_v28 = vld [vmem:[#allocation2 + $0x180] sm:$0xff]  ;;  %v1209_v29 = vld [vmem:[#allocation2 + $0x98] sm:$0xff] }
 0x11a   : > { %1760 = vst.msk [vmem:[%s2612_s7 + $0xac] sm:$0xf] %vm1716_vm4, %v2092_v41  ;;  %1726 = vst.msk [vmem:[%s2612_s7 + $0x24] sm:$0xf] %vm1716_vm4, %v2058_v45  ;;  %v1274_v58 = vmul.f32 %v2579_v1, %v1203_v43  ;;  %v1306_v59 = vmul.f32 %v2579_v1, %v1235_v44  ;;  %v1410_v61 = vmax.f32 %v1346_v49, 0.0  ;;  %v1376_v0 = vadd.f32 %v2584_v11, %v1305_v51  ;;  %v1241_v30 = vld [vmem:[#allocation2 + $0x198] sm:$0xff] }
 0x11b   : > { %1758 = vst.msk [vmem:[%s2612_s7 + $0xa4] sm:$0xf] %vm1716_vm4, %v2090_v46  ;;  %v1347_v2 = vadd.f32 %v2584_v11, %v1276_v52  ;;  %v1379_v3 = vadd.f32 %v2584_v11, %v1308_v53  ;;  %v1442_v6 = vmax.f32 %v1378_v54, 0.0  ;;  %v1408_v9 = vmax.f32 %v1344_v57, 0.0  ;;  %v2791_v8 = vpop.f32.mrb[27].mxu1  ;;  %v1207_v35 = vld [vmem:[#allocation2 + $0x88] sm:$0xff] }
 0x11c   : > { %v1345_v10 = vadd.f32 %v2584_v11, %v1274_v58  ;;  %v1377_v12 = vadd.f32 %v2584_v11, %v1306_v59  ;;  %v2063_v18 = vpack.c.bf16 %v1410_v61, %v1410_v61  ;;  %v1440_v19 = vmax.f32 %v1376_v0, 0.0  ;;  %v1239_v36 = vld [vmem:[#allocation2 + $0x188] sm:$0xff]  ;;  %v392_v59 = vld [vmem:[#allocation2 + $0xb0] sm:$0xff]  ;;  %v390_v0 = vld [vmem:[#allocation2 + $0xa0] sm:$0xff] }
 0x11d   : > { %v1411_v20 = vmax.f32 %v1347_v2, 0.0  ;;  %v1443_v22 = vmax.f32 %v1379_v3, 0.0  ;;  %v2095_v25 = vpack.c.bf16 %v1442_v6, %v1442_v6  ;;  %v2061_v62 = vpack.c.bf16 %v1408_v9, %v1408_v9  ;;  %v424_v61 = vld [vmem:[#allocation2 + $0x1b0] sm:$0xff] }
 0x11e   : > { %v1409_v7 = vmax.f32 %v1345_v10, 0.0  ;;  %v1441_v27 = vmax.f32 %v1377_v12, 0.0  ;;  %1731 = vst.msk [vmem:[%s2612_s7 + $0x38] sm:$0xf] %vm1716_vm4, %v2063_v18  ;;  %v2093_v31 = vpack.c.bf16 %v1440_v19, %v1440_v19  ;;  %v1279_v34 = vmul.f32 %v2579_v1, %v1208_v13  ;;  %v2820_v52 = vpop.f32.mrb[28].mxu0  ;;  %v422_v13 = vld [vmem:[#allocation2 + $0x1a0] sm:$0xff] }
 0x11f   : > { %v2064_v32 = vpack.c.bf16 %v1411_v20, %v1411_v20  ;;  %v2096_v33 = vpack.c.bf16 %v1443_v22, %v1443_v22  ;;  %1763 = vst.msk [vmem:[%s2612_s7 + $0xb8] sm:$0xf] %vm1716_vm4, %v2095_v25  ;;  %1729 = vst.msk [vmem:[%s2612_s7 + $0x30] sm:$0xf] %vm1716_vm4, %v2061_v62  ;;  %v1311_v41 = vmul.f32 %v2579_v1, %v1240_v14  ;;  %v2825_v2 = vpop.f32.mrb[28].mxu1  ;;  %v2827_v3 = vpop.f32.mrb[29].mxu0 }
 0x120   : > { %v2062_v39 = vpack.c.bf16 %v1409_v7, %v1409_v7  ;;  %v2094_v40 = vpack.c.bf16 %v1441_v27, %v1441_v27  ;;  %v1277_v42 = vmul.f32 %v2579_v1, %v1206_v56  ;;  %1761 = vst.msk [vmem:[%s2612_s7 + $0xb0] sm:$0xf] %vm1716_vm4, %v2093_v31  ;;  %v1350_v43 = vadd.f32 %v2584_v11, %v1279_v34  ;;  %v393_v14 = vld [vmem:[#allocation2 + $0xb8] sm:$0xff]  ;;  %v391_v19 = vld [vmem:[#allocation2 + $0xa8] sm:$0xff]  ;;  %v2831_v20 = vpop.f32.mrb[29].mxu1  ;;  %v2833_v22 = vpop.f32.mrb[30].mxu0 }
 0x121   : > { %1732 = vst.msk [vmem:[%s2612_s7 + $0x3c] sm:$0xf] %vm1716_vm4, %v2064_v32  ;;  %1764 = vst.msk [vmem:[%s2612_s7 + $0xbc] sm:$0xf] %vm1716_vm4, %v2096_v33  ;;  %v1309_v44 = vmul.f32 %v2579_v1, %v1238_v28  ;;  %v1280_v45 = vmul.f32 %v2579_v1, %v1209_v29  ;;  %v1312_v46 = vmul.f32 %v2579_v1, %v1241_v30  ;;  %v425_v18 = vld [vmem:[#allocation2 + $0x1b8] sm:$0xff]  ;;  %v423_v27 = vld [vmem:[#allocation2 + $0x1a8] sm:$0xff] }
 0x122   : > { %1730 = vst.msk [vmem:[%s2612_s7 + $0x34] sm:$0xf] %vm1716_vm4, %v2062_v39  ;;  %1762 = vst.msk [vmem:[%s2612_s7 + $0xb4] sm:$0xf] %vm1716_vm4, %v2094_v40  ;;  %v1382_v47 = vadd.f32 %v2584_v11, %v1311_v41  ;;  %v1348_v48 = vadd.f32 %v2584_v11, %v1277_v42  ;;  %v1278_v49 = vmul.f32 %v2579_v1, %v1207_v35  ;;  %v1414_v53 = vmax.f32 %v1350_v43, 0.0  ;;  %v2835_v28 = vpop.f32.mrb[30].mxu1 }
 0x123   : > { %v1310_v51 = vmul.f32 %v2579_v1, %v1239_v36  ;;  %v1380_v54 = vadd.f32 %v2584_v11, %v1309_v44  ;;  %v1351_v57 = vadd.f32 %v2584_v11, %v1280_v45  ;;  %v1383_v58 = vadd.f32 %v2584_v11, %v1312_v46  ;;  %v2837_v29 = vpop.f32.mrb[31].mxu0  ;;  %v396_v34 = vld [vmem:[#allocation2 + $0xd0] sm:$0xff]  ;;  %v394_v36 = vld [vmem:[#allocation2 + $0xc0] sm:$0xff]  ;;  %v2839_v39 = vpop.f32.mrb[31].mxu1  ;;  %v397_v45 = vld [vmem:[#allocation2 + $0xd8] sm:$0xff] }
 0x124   : > { %v1446_v6 = vmax.f32 %v1382_v47, 0.0  ;;  %v1412_v9 = vmax.f32 %v1348_v48, 0.0  ;;  %v1349_v10 = vadd.f32 %v2584_v11, %v1278_v49  ;;  %v2067_v56 = vpack.c.bf16 %v1414_v53, %v1414_v53  ;;  %v428_v35 = vld [vmem:[#allocation2 + $0x1d0] sm:$0xff]  ;;  %v426_v44 = vld [vmem:[#allocation2 + $0x1c0] sm:$0xff]  ;;  %v429_v46 = vld [vmem:[#allocation2 + $0x1d8] sm:$0xff] }
 0x125   : > { %v1381_v12 = vadd.f32 %v2584_v11, %v1310_v51  ;;  %v1444_v25 = vmax.f32 %v1380_v54, 0.0  ;;  %v1415_v62 = vmax.f32 %v1351_v57, 0.0  ;;  %v1447_v7 = vmax.f32 %v1383_v58, 0.0  ;;  %v395_v53 = vld [vmem:[#allocation2 + $0xc8] sm:$0xff]  ;;  %v400_v57 = vld [vmem:[#allocation2 + $0xf0] sm:$0xff] }
 0x126   : > { %v2099_v30 = vpack.c.bf16 %v1446_v6, %v1446_v6  ;;  %v2065_v31 = vpack.c.bf16 %v1412_v9, %v1412_v9  ;;  %v1413_v32 = vmax.f32 %v1349_v10, 0.0  ;;  %1735 = vst.msk [vmem:[%s2612_s7 + $0x48] sm:$0xf] %vm1716_vm4, %v2067_v56  ;;  %v1080_v43 = vadd.f32 %v2724_v15, %v392_v59  ;;  %v427_v54 = vld [vmem:[#allocation2 + $0x1c8] sm:$0xff]  ;;  %v432_v59 = vld [vmem:[#allocation2 + $0x1f0] sm:$0xff]  ;;  %v433_v9 = vld [vmem:[#allocation2 + $0x1f8] sm:$0xff] }
 0x127   : > { %v1445_v33 = vmax.f32 %v1381_v12, 0.0  ;;  %v2097_v40 = vpack.c.bf16 %v1444_v25, %v1444_v25  ;;  %v2068_v41 = vpack.c.bf16 %v1415_v62, %v1415_v62  ;;  %v2100_v42 = vpack.c.bf16 %v1447_v7, %v1447_v7  ;;  %v399_v10 = vld [vmem:[#allocation2 + $0xe8] sm:$0xff] }
 0x128   : > { %1767 = vst.msk [vmem:[%s2612_s7 + $0xc8] sm:$0xf] %vm1716_vm4, %v2099_v30  ;;  %1733 = vst.msk [vmem:[%s2612_s7 + $0x40] sm:$0xf] %vm1716_vm4, %v2065_v31  ;;  %v2066_v47 = vpack.c.bf16 %v1413_v32, %v1413_v32  ;;  %v1112_v49 = vadd.f32 %v2729_v21, %v424_v61  ;;  %v1078_v51 = vadd.f32 %v2731_v55, %v390_v0  ;;  %v398_v61 = vld [vmem:[#allocation2 + $0xe0] sm:$0xff] }
 0x129   : > { %v2098_v48 = vpack.c.bf16 %v1445_v33, %v1445_v33  ;;  %1765 = vst.msk [vmem:[%s2612_s7 + $0xc0] sm:$0xf] %vm1716_vm4, %v2097_v40  ;;  %1736 = vst.msk [vmem:[%s2612_s7 + $0x4c] sm:$0xf] %vm1716_vm4, %v2068_v41  ;;  %v1110_v15 = vadd.f32 %v2735_v26, %v422_v13  ;;  %v1081_v58 = vadd.f32 %v2737_v63, %v393_v14  ;;  %v430_v0 = vld [vmem:[#allocation2 + $0x1e0] sm:$0xff] }
 0x12a   : > { %1768 = vst.msk [vmem:[%s2612_s7 + $0xcc] sm:$0xf] %vm1716_vm4, %v2100_v42  ;;  %v1113_v21 = vadd.f32 %v2739_v16, %v425_v18  ;;  %v1079_v55 = vadd.f32 %v2741_v37, %v391_v19  ;;  %1734 = vst.msk [vmem:[%s2612_s7 + $0x44] sm:$0xf] %vm1716_vm4, %v2066_v47  ;;  %v1111_v6 = vadd.f32 %v2743_v38, %v423_v27  ;;  %v401_v37 = vld [vmem:[#allocation2 + $0xf8] sm:$0xff] }
 0x12b   : > { %1145 = vst.msk [vmem:[#allocation2 + $0xb0] sm:$0xff] %vm305_vm2, %v1080_v43  ;;  %1177 = vst.msk [vmem:[#allocation2 + $0x1b0] sm:$0xff] %vm305_vm2, %v1112_v49  ;;  %v1084_v26 = vadd.f32 %v2772_v60, %v396_v34  ;;  %v1116_v63 = vadd.f32 %v2777_v4, %v428_v35  ;;  %v1082_v16 = vadd.f32 %v2779_v5, %v394_v36  ;;  %v431_v5 = vld [vmem:[#allocation2 + $0x1e8] sm:$0xff] }
 0x12c   : > { %1766 = vst.msk [vmem:[%s2612_s7 + $0xc4] sm:$0xf] %vm1716_vm4, %v2098_v48  ;;  %v1114_v12 = vadd.f32 %v2783_v50, %v426_v44  ;;  %v1085_v38 = vadd.f32 %v2785_v17, %v397_v45  ;;  %v1117_v60 = vadd.f32 %v2787_v23, %v429_v46  ;;  %v1083_v4 = vadd.f32 %v2789_v24, %v395_v53 }
 0x12d   : > { %1143 = vst.msk [vmem:[#allocation2 + $0xa0] sm:$0xff] %vm305_vm2, %v1078_v51  ;;  %1175 = vst.msk [vmem:[#allocation2 + $0x1a0] sm:$0xff] %vm305_vm2, %v1110_v15  ;;  %v1115_v13 = vadd.f32 %v2791_v8, %v427_v54  ;;  %v1088_v14 = vadd.f32 %v2820_v52, %v400_v57  ;;  %v1120_v50 = vadd.f32 %v2825_v2, %v432_v59 }
 0x12e   : > { %1146 = vst.msk [vmem:[#allocation2 + $0xb8] sm:$0xff] %vm305_vm2, %v1081_v58  ;;  %1178 = vst.msk [vmem:[#allocation2 + $0x1b8] sm:$0xff] %vm305_vm2, %v1113_v21  ;;  %v1086_v17 = vadd.f32 %v2827_v3, %v398_v61  ;;  %v1118_v23 = vadd.f32 %v2831_v20, %v430_v0  ;;  %v1089_v24 = vadd.f32 %v2833_v22, %v401_v37 }
 0x12f   : > { %1144 = vst.msk [vmem:[#allocation2 + $0xa8] sm:$0xff] %vm305_vm2, %v1079_v55  ;;  %1176 = vst.msk [vmem:[#allocation2 + $0x1a8] sm:$0xff] %vm305_vm2, %v1111_v6  ;;  %v1121_v8 = vadd.f32 %v2835_v28, %v433_v9  ;;  %v1087_v52 = vadd.f32 %v2837_v29, %v399_v10  ;;  %v1119_v2 = vadd.f32 %v2839_v39, %v431_v5 }
 0x130   : > { %1149 = vst.msk [vmem:[#allocation2 + $0xd0] sm:$0xff] %vm305_vm2, %v1084_v26  ;;  %1181 = vst.msk [vmem:[#allocation2 + $0x1d0] sm:$0xff] %vm305_vm2, %v1116_v63 }
 0x131   : > { %1147 = vst.msk [vmem:[#allocation2 + $0xc0] sm:$0xff] %vm305_vm2, %v1082_v16  ;;  %1179 = vst.msk [vmem:[#allocation2 + $0x1c0] sm:$0xff] %vm305_vm2, %v1114_v12  ;;  %v2931_v12 = vld [vmem:[%s3022_s2] ss:$0 sm:$0xff] }
 0x132   : > { %1150 = vst.msk [vmem:[#allocation2 + $0xd8] sm:$0xff] %vm305_vm2, %v1085_v38  ;;  %1182 = vst.msk [vmem:[#allocation2 + $0x1d8] sm:$0xff] %vm305_vm2, %v1117_v60  ;;  %v1212_v3 = vld [vmem:[#allocation2 + $0xb0] sm:$0xff] }
 0x133   : > { %1148 = vst.msk [vmem:[#allocation2 + $0xc8] sm:$0xff] %vm305_vm2, %v1083_v4  ;;  %1180 = vst.msk [vmem:[#allocation2 + $0x1c8] sm:$0xff] %vm305_vm2, %v1115_v13  ;;  %v1283_v18 = vmul.f32 %v2579_v1, %v1212_v3  ;;  %v1244_v19 = vld [vmem:[#allocation2 + $0x1b0] sm:$0xff] }
 0x134   : > { %1153 = vst.msk [vmem:[#allocation2 + $0xf0] sm:$0xff] %vm305_vm2, %v1088_v14  ;;  %1185 = vst.msk [vmem:[#allocation2 + $0x1f0] sm:$0xff] %vm305_vm2, %v1120_v50  ;;  %v1210_v20 = vld [vmem:[#allocation2 + $0xa0] sm:$0xff]  ;;  %v1315_v22 = vmul.f32 %v2579_v1, %v1244_v19 }
 0x135   : > { %1151 = vst.msk [vmem:[#allocation2 + $0xe0] sm:$0xff] %vm305_vm2, %v1086_v17  ;;  %1183 = vst.msk [vmem:[#allocation2 + $0x1e0] sm:$0xff] %vm305_vm2, %v1118_v23  ;;  %v1281_v56 = vmul.f32 %v2579_v1, %v1210_v20  ;;  %v1242_v25 = vld [vmem:[#allocation2 + $0x1a0] sm:$0xff]  ;;  %v1213_v62 = vld [vmem:[#allocation2 + $0xb8] sm:$0xff]  ;;  %v1354_v27 = vadd.f32 %v2584_v11, %v1283_v18 }
 0x136   : > { %1154 = vst.msk [vmem:[#allocation2 + $0xf8] sm:$0xff] %vm305_vm2, %v1089_v24  ;;  %1186 = vst.msk [vmem:[#allocation2 + $0x1f8] sm:$0xff] %vm305_vm2, %v1121_v8  ;;  %v1245_v7 = vld [vmem:[#allocation2 + $0x1b8] sm:$0xff]  ;;  %v1313_v28 = vmul.f32 %v2579_v1, %v1242_v25  ;;  %v1284_v29 = vmul.f32 %v2579_v1, %v1213_v62  ;;  %v1211_v31 = vld [vmem:[#allocation2 + $0xa8] sm:$0xff]  ;;  %v1386_v33 = vadd.f32 %v2584_v11, %v1315_v22 }
 0x137   : > { %1152 = vst.msk [vmem:[#allocation2 + $0xe8] sm:$0xff] %vm305_vm2, %v1087_v52  ;;  %1184 = vst.msk [vmem:[#allocation2 + $0x1e8] sm:$0xff] %vm305_vm2, %v1119_v2  ;;  %v1316_v30 = vmul.f32 %v2579_v1, %v1245_v7  ;;  %v1243_v32 = vld [vmem:[#allocation2 + $0x1a8] sm:$0xff]  ;;  %v1352_v34 = vadd.f32 %v2584_v11, %v1281_v56  ;;  %v1282_v35 = vmul.f32 %v2579_v1, %v1211_v31  ;;  %v1418_v39 = vmax.f32 %v1354_v27, 0.0  ;;  %v1216_v47 = vld [vmem:[#allocation2 + $0xd0] sm:$0xff] }
 0x138   : > { %v1314_v36 = vmul.f32 %v2579_v1, %v1243_v32  ;;  %v1384_v40 = vadd.f32 %v2584_v11, %v1313_v28  ;;  %v1355_v41 = vadd.f32 %v2584_v11, %v1284_v29  ;;  %v1450_v43 = vmax.f32 %v1386_v33, 0.0  ;;  %v1248_v54 = vld [vmem:[#allocation2 + $0x1d0] sm:$0xff]  ;;  %v1214_v57 = vld [vmem:[#allocation2 + $0xc0] sm:$0xff] }
 0x139   : > { %v1387_v42 = vadd.f32 %v2584_v11, %v1316_v30  ;;  %v1416_v44 = vmax.f32 %v1352_v34, 0.0  ;;  %v1353_v45 = vadd.f32 %v2584_v11, %v1282_v35  ;;  %v2071_v48 = vpack.c.bf16 %v1418_v39, %v1418_v39  ;;  %v1246_v59 = vld [vmem:[#allocation2 + $0x1c0] sm:$0xff]  ;;  %v1217_v61 = vld [vmem:[#allocation2 + $0xd8] sm:$0xff] }
 0x13a   : > { %v1385_v46 = vadd.f32 %v2584_v11, %v1314_v36  ;;  %v1448_v49 = vmax.f32 %v1384_v40, 0.0  ;;  %v1419_v51 = vmax.f32 %v1355_v41, 0.0  ;;  %v2103_v15 = vpack.c.bf16 %v1450_v43, %v1450_v43  ;;  %v1249_v0 = vld [vmem:[#allocation2 + $0x1d8] sm:$0xff]  ;;  %v1215_v16 = vld [vmem:[#allocation2 + $0xc8] sm:$0xff] }
 0x13b   : > { %v1451_v53 = vmax.f32 %v1387_v42, 0.0  ;;  %v2069_v58 = vpack.c.bf16 %v1416_v44, %v1416_v44  ;;  %v1417_v21 = vmax.f32 %v1353_v45, 0.0  ;;  %1739 = vst.msk [vmem:[%s2612_s7 + $0x58] sm:$0xf] %vm1716_vm4, %v2071_v48  ;;  %v1287_v63 = vmul.f32 %v2579_v1, %v1216_v47  ;;  %v1247_v37 = vld [vmem:[#allocation2 + $0x1c8] sm:$0xff]  ;;  %v1220_v56 = vld [vmem:[#allocation2 + $0xf0] sm:$0xff] }
 0x13c   : > { %v1449_v55 = vmax.f32 %v1385_v46, 0.0  ;;  %v2101_v11 = vpack.c.bf16 %v1448_v49, %v1448_v49  ;;  %v2072_v6 = vpack.c.bf16 %v1419_v51, %v1419_v51  ;;  %1771 = vst.msk [vmem:[%s2612_s7 + $0xd8] sm:$0xf] %vm1716_vm4, %v2103_v15  ;;  %v1319_v38 = vmul.f32 %v2931_v12, %v1248_v54  ;;  %v2944_v1 = vld [vmem:[%s3023_s3] ss:$0 sm:$0xff]  ;;  %v1252_v28 = vld [vmem:[#allocation2 + $0x1f0] sm:$0xff] }
 0x13d   : > { %v2104_v26 = vpack.c.bf16 %v1451_v53, %v1451_v53  ;;  %1737 = vst.msk [vmem:[%s2612_s7 + $0x50] sm:$0xf] %vm1716_vm4, %v2069_v58  ;;  %v2070_v9 = vpack.c.bf16 %v1417_v21, %v1417_v21  ;;  %v1285_v60 = vmul.f32 %v2931_v12, %v1214_v57  ;;  %v1358_v4 = vadd.f32 %v2944_v1, %v1287_v63  ;;  %v1218_v29 = vld [vmem:[#allocation2 + $0xe0] sm:$0xff]  ;;  %v1221_v35 = vld [vmem:[#allocation2 + $0xf8] sm:$0xff] }
 0x13e   : > { %v2102_v10 = vpack.c.bf16 %v1449_v55, %v1449_v55  ;;  %1769 = vst.msk [vmem:[%s2612_s7 + $0xd0] sm:$0xf] %vm1716_vm4, %v2101_v11  ;;  %1740 = vst.msk [vmem:[%s2612_s7 + $0x5c] sm:$0xf] %vm1716_vm4, %v2072_v6  ;;  %v1317_v5 = vmul.f32 %v2931_v12, %v1246_v59  ;;  %v1288_v13 = vmul.f32 %v2931_v12, %v1217_v61  ;;  %v1250_v34 = vld [vmem:[#allocation2 + $0x1e0] sm:$0xff]  ;;  %v1253_v36 = vld [vmem:[#allocation2 + $0x1f8] sm:$0xff] }
 0x13f   : > { %1772 = vst.msk [vmem:[%s2612_s7 + $0xdc] sm:$0xf] %vm1716_vm4, %v2104_v26  ;;  %v1320_v14 = vmul.f32 %v2931_v12, %v1249_v0  ;;  %1738 = vst.msk [vmem:[%s2612_s7 + $0x54] sm:$0xf] %vm1716_vm4, %v2070_v9  ;;  %v1390_v50 = vadd.f32 %v2944_v1, %v1319_v38  ;;  %v1356_v17 = vadd.f32 %v2944_v1, %v1285_v60  ;;  %v1422_v8 = vmax.f32 %v1358_v4, 0.0  ;;  %v1219_v43 = vld [vmem:[#allocation2 + $0xe8] sm:$0xff] }
 0x140   : > { %1770 = vst.msk [vmem:[%s2612_s7 + $0xd4] sm:$0xf] %vm1716_vm4, %v2102_v10  ;;  %v1286_v23 = vmul.f32 %v2931_v12, %v1215_v16  ;;  %v1318_v24 = vmul.f32 %v2931_v12, %v1247_v37  ;;  %v1388_v52 = vadd.f32 %v2944_v1, %v1317_v5  ;;  %v1359_v2 = vadd.f32 %v2944_v1, %v1288_v13  ;;  %v1251_v44 = vld [vmem:[#allocation2 + $0x1e8] sm:$0xff] }
 0x141   : > { %v1391_v3 = vadd.f32 %v2944_v1, %v1320_v14  ;;  %v1454_v18 = vmax.f32 %v1390_v50, 0.0  ;;  %v1420_v19 = vmax.f32 %v1356_v17, 0.0  ;;  %v2075_v25 = vpack.c.bf16 %v1422_v8, %v1422_v8 }
 0x142   : > { %v1357_v20 = vadd.f32 %v2944_v1, %v1286_v23  ;;  %v1389_v22 = vadd.f32 %v2944_v1, %v1318_v24  ;;  %v1452_v62 = vmax.f32 %v1388_v52, 0.0  ;;  %v1423_v7 = vmax.f32 %v1359_v2, 0.0 }
 0x143   : > { %v1455_v27 = vmax.f32 %v1391_v3, 0.0  ;;  %v2107_v30 = vpack.c.bf16 %v1454_v18, %v1454_v18  ;;  %v2073_v31 = vpack.c.bf16 %v1420_v19, %v1420_v19  ;;  %1743 = vst.msk [vmem:[%s2612_s7 + $0x68] sm:$0xf] %vm1716_vm4, %v2075_v25  ;;  %v1291_v42 = vmul.f32 %v2931_v12, %v1220_v56 }
 0x144   : > { %v1421_v32 = vmax.f32 %v1357_v20, 0.0  ;;  %v1453_v33 = vmax.f32 %v1389_v22, 0.0  ;;  %v2105_v39 = vpack.c.bf16 %v1452_v62, %v1452_v62  ;;  %v2076_v40 = vpack.c.bf16 %v1423_v7, %v1423_v7 }
 0x145   : > { %v2108_v41 = vpack.c.bf16 %v1455_v27, %v1455_v27  ;;  %1775 = vst.msk [vmem:[%s2612_s7 + $0xe8] sm:$0xf] %vm1716_vm4, %v2107_v30  ;;  %1741 = vst.msk [vmem:[%s2612_s7 + $0x60] sm:$0xf] %vm1716_vm4, %v2073_v31  ;;  %v1323_v47 = vmul.f32 %v2931_v12, %v1252_v28  ;;  %v1289_v48 = vmul.f32 %v2931_v12, %v1218_v29 }
 0x146   : > { %v2074_v45 = vpack.c.bf16 %v1421_v32, %v1421_v32  ;;  %v2106_v46 = vpack.c.bf16 %v1453_v33, %v1453_v33  ;;  %1773 = vst.msk [vmem:[%s2612_s7 + $0xe0] sm:$0xf] %vm1716_vm4, %v2105_v39  ;;  %1744 = vst.msk [vmem:[%s2612_s7 + $0x6c] sm:$0xf] %vm1716_vm4, %v2076_v40  ;;  %v1362_v49 = vadd.f32 %v2944_v1, %v1291_v42 }
 0x147   : > { %1776 = vst.msk [vmem:[%s2612_s7 + $0xec] sm:$0xf] %vm1716_vm4, %v2108_v41  ;;  %v1321_v51 = vmul.f32 %v2931_v12, %v1250_v34  ;;  %v1292_v53 = vmul.f32 %v2931_v12, %v1221_v35  ;;  %v1324_v54 = vmul.f32 %v2931_v12, %v1253_v36  ;;  %v1394_v57 = vadd.f32 %v2944_v1, %v1323_v47 }
 0x148   : > { %1742 = vst.msk [vmem:[%s2612_s7 + $0x64] sm:$0xf] %vm1716_vm4, %v2074_v45  ;;  %1774 = vst.msk [vmem:[%s2612_s7 + $0xe4] sm:$0xf] %vm1716_vm4, %v2106_v46  ;;  %v1360_v15 = vadd.f32 %v2944_v1, %v1289_v48  ;;  %v1290_v58 = vmul.f32 %v2931_v12, %v1219_v43  ;;  %v1322_v21 = vmul.f32 %v2931_v12, %v1251_v44  ;;  %v1426_v55 = vmax.f32 %v1362_v49, 0.0 }
 0x149   : > { %v1392_v59 = vadd.f32 %v2944_v1, %v1321_v51  ;;  %v1363_v61 = vadd.f32 %v2944_v1, %v1292_v53  ;;  %v1395_v0 = vadd.f32 %v2944_v1, %v1324_v54  ;;  %v1458_v11 = vmax.f32 %v1394_v57, 0.0 }
 0x14a   : > { %v1424_v6 = vmax.f32 %v1360_v15, 0.0  ;;  %v1361_v26 = vadd.f32 %v2944_v1, %v1290_v58  ;;  %v1393_v63 = vadd.f32 %v2944_v1, %v1322_v21  ;;  %v2079_v16 = vpack.c.bf16 %v1426_v55, %v1426_v55 }
 0x14b   : > { %v1456_v37 = vmax.f32 %v1392_v59, 0.0  ;;  %v1427_v9 = vmax.f32 %v1363_v61, 0.0  ;;  %v1459_v10 = vmax.f32 %v1395_v0, 0.0  ;;  %v2111_v12 = vpack.c.bf16 %v1458_v11, %v1458_v11 }
 0x14c   : > { %v2077_v38 = vpack.c.bf16 %v1424_v6, %v1424_v6  ;;  %v1425_v60 = vmax.f32 %v1361_v26, 0.0  ;;  %v1457_v4 = vmax.f32 %v1393_v63, 0.0  ;;  %1747 = vst.msk [vmem:[%s2612_s7 + $0x78] sm:$0xf] %vm1716_vm4, %v2079_v16 }
 0x14d   : > { %v2109_v5 = vpack.c.bf16 %v1456_v37, %v1456_v37  ;;  %v2080_v13 = vpack.c.bf16 %v1427_v9, %v1427_v9  ;;  %v2112_v14 = vpack.c.bf16 %v1459_v10, %v1459_v10  ;;  %1779 = vst.msk [vmem:[%s2612_s7 + $0xf8] sm:$0xf] %vm1716_vm4, %v2111_v12 }
 0x14e   : > { %1745 = vst.msk [vmem:[%s2612_s7 + $0x70] sm:$0xf] %vm1716_vm4, %v2077_v38  ;;  %v2078_v1 = vpack.c.bf16 %v1425_v60, %v1425_v60  ;;  %v2110_v50 = vpack.c.bf16 %v1457_v4, %v1457_v4 }
 0x14f   : > { %1777 = vst.msk [vmem:[%s2612_s7 + $0xf0] sm:$0xf] %vm1716_vm4, %v2109_v5  ;;  %1748 = vst.msk [vmem:[%s2612_s7 + $0x7c] sm:$0xf] %vm1716_vm4, %v2080_v13 }
 0x150   : > { %1780 = vst.msk [vmem:[%s2612_s7 + $0xfc] sm:$0xf] %vm1716_vm4, %v2112_v14  ;;  %1746 = vst.msk [vmem:[%s2612_s7 + $0x74] sm:$0xf] %vm1716_vm4, %v2078_v1 }
 0x151   : > { %1778 = vst.msk [vmem:[%s2612_s7 + $0xf4] sm:$0xf] %vm1716_vm4, %v2110_v50 }
 0x152 PF: > { %s14_s17 = sadd.s32 1, %s2297_s17   ;;  %s3026_s15 = smov %s2293_s16 }
 0x153   : > { %p11_p5 = scmp.ge.s32.totalorder %s14_s17, 34   ;;  %s3027_s16 = smov %s3029_s18 }
 0x155   :  { %13 = sbr.rel (!%p11_p5) target bundleno = 2 (0x2), region = 83 }

</bundles_post_ra>
